<compile_context>
chip_gen: v6e
topology: v6e:2x2x1
jax: 0.10.0
libtpu: 0.0.40
codegen_flags: <defaults>
</compile_context>

<pallas_src>
import functools

import jax
import jax.numpy as jnp
from jax.experimental import pallas as pl
from jax.experimental.pallas import tpu as pltpu

BN_EPS = 1e-5
C1 = 32      # conv1 out_channels
LANE = 128   # TPU lane width; fc output padded to a multiple of this


def _dqn_fused_kernel(xt_ref, cw_ref, wfc_ref, bfc_ref, out_ref, *, B, T1, Tp):
    """Fused DQN forward.

    Layouts (all full-array VMEM blocks):
      xt_ref : (len_state, B)   input, time on sublanes
      cw_ref : (4, C1)          rows = [conv_w0, conv_w1, bn_gamma, bn_beta]
      wfc_ref: (Tp, C1, OPAD)   fc weight as (time, channel, out), out zero-padded
      bfc_ref: (1, OPAD)        fc bias, zero-padded
      out_ref: (B, OPAD)
    """
    w0 = cw_ref[0:1, :]       # (1, C1)
    w1 = cw_ref[1:2, :]
    gamma = cw_ref[2:3, :]
    beta = cw_ref[3:4, :]

    # --- conv1 (kernel_size=2, valid): two VPU broadcast FMAs per batch ---
    # conv bias omitted: it cancels exactly in training-mode BN mean subtraction.
    blocks = []
    for b in range(B):
        xl = xt_ref[0:T1, b:b + 1]          # (T1, 1)  -> x[b, t]
        xr = xt_ref[1:T1 + 1, b:b + 1]      # (T1, 1)  -> x[b, t+1]
        blocks.append(xl * w0 + xr * w1)    # (T1, C1)
    h = jnp.concatenate(blocks, axis=0)     # (B*T1, C1), channels on lanes

    # --- BatchNorm1d (training mode: batch stats, biased variance) + ReLU ---
    mean = jnp.mean(h, axis=0, keepdims=True)                     # (1, C1)
    var = jnp.mean(jnp.square(h - mean), axis=0, keepdims=True)   # (1, C1)
    hn = (h - mean) * jax.lax.rsqrt(var + BN_EPS) * gamma + beta
    hn = jnp.maximum(hn, 0.0)

    # --- MaxPool1d(2,2) fused with fc: per pooled step, max of a sublane pair
    #     then a (1,C1)@(C1,OPAD) MXU accumulate into a lane-dense output row ---
    accs = [bfc_ref[...] for _ in range(B)]          # each (1, OPAD)
    for t in range(Tp):
        w_t = wfc_ref[t]                             # (C1, OPAD)
        for b in range(B):
            base = b * T1 + 2 * t
            pair = hn[base:base + 2, :]              # (2, C1) static slice
            p = jnp.max(pair, axis=0, keepdims=True)  # (1, C1)
            accs[b] = accs[b] + jnp.dot(p, w_t, preferred_element_type=jnp.float32)
    out_ref[...] = jnp.concatenate(accs, axis=0)     # (B, OPAD)


def prepare_params(params, M, len_state):
    """One-time parameter preprocessing (hoisted out of the forward hot path)."""
    T1 = len_state - 1
    Tp = T1 // 2
    n_out = 2 * M
    opad = ((n_out + LANE - 1) // LANE) * LANE

    w = params["conv1_w"]                                    # (C1, 1, 2)
    cw = jnp.stack(
        [w[:, 0, 0], w[:, 0, 1], params["bn1_gamma"], params["bn1_beta"]], axis=0
    )                                                        # (4, C1)
    # conv1_b intentionally dropped: redundant under training-mode BatchNorm.

    # PyTorch fc weight is (2M, C1*Tp) over a channel-major flatten (c*Tp + t).
    # Re-lay out once as (t, c, out) and zero-pad 'out' to a full lane width.
    wfc = params["fc_w"].reshape(n_out, C1, Tp)
    wfc = jnp.transpose(wfc, (2, 1, 0))                      # (Tp, C1, 2M)
    wfc = jnp.pad(wfc, ((0, 0), (0, 0), (0, opad - n_out)))  # (Tp, C1, OPAD)
    bfc = jnp.pad(params["fc_b"], (0, opad - n_out)).reshape(1, opad)
    return {"cw": cw, "wfc": wfc, "bfc": bfc}


def dqn_forward(x, prep, M):
    """x: (B, 1, len_state) as in the PyTorch module. Returns (B, 2*M)."""
    B, _, L = x.shape
    T1 = L - 1
    Tp = T1 // 2
    opad = prep["bfc"].shape[1]

    xt = jnp.transpose(x[:, 0, :])   # (L, B): tiny one-op layout change, no duplication

    kernel = functools.partial(_dqn_fused_kernel, B=B, T1=T1, Tp=Tp)
    out = pl.pallas_call(
        kernel,
        out_shape=jax.ShapeDtypeStruct((B, opad), jnp.float32),
        grid=(1,),
        in_specs=[
            pl.BlockSpec((L, B), lambda i: (0, 0)),
            pl.BlockSpec((4, C1), lambda i: (0, 0)),
            pl.BlockSpec((Tp, C1, opad), lambda i: (0, 0, 0)),
            pl.BlockSpec((1, opad), lambda i: (0, 0)),
        ],
        out_specs=pl.BlockSpec((B, opad), lambda i: (0, 0)),
        compiler_params=pltpu.CompilerParams(dimension_semantics=("arbitrary",)),
    )(xt, prep["cw"], prep["wfc"], prep["bfc"])
    return out[:, :2 * M]


def dqn_reference(x, params):
    # Pure-JAX reference mirroring the PyTorch forward (training-mode BN, with bias).
    h = jax.lax.conv_general_dilated(
        x, params["conv1_w"], window_strides=(1,), padding="VALID",
        dimension_numbers=("NCH", "OIH", "NCH"))
    h = h + params["conv1_b"][None, :, None]
    mean = jnp.mean(h, axis=(0, 2), keepdims=True)
    var = jnp.mean((h - mean) ** 2, axis=(0, 2), keepdims=True)
    h = (h - mean) / jnp.sqrt(var + BN_EPS)
    h = h * params["bn1_gamma"][None, :, None] + params["bn1_beta"][None, :, None]
    h = jnp.maximum(h, 0.0)
    B, c1, T1 = h.shape
    Tp = T1 // 2
    h = h[:, :, : 2 * Tp].reshape(B, c1, Tp, 2).max(axis=-1)
    flat = h.reshape(B, c1 * Tp)  # PyTorch channel-major flatten
    return flat @ params["fc_w"].T + params["fc_b"][None, :]


if __name__ == "__main__":
    # Small shapes consistent with the module: N uavs, K steps, L embed dim, M cities.
    N, K, L, M = 2, 2, 4, 4
    len_state = 1 + 2 * M + 2 * K * M + (N - 1) * L   # = 29
    B = 2
    Tp = (len_state - 1) // 2

    key = jax.random.PRNGKey(0)
    ks = jax.random.split(key, 7)
    params = {
        "conv1_w": 0.1 * jax.random.normal(ks[0], (C1, 1, 2), jnp.float32),
        "conv1_b": 0.1 * jax.random.normal(ks[1], (C1,), jnp.float32),
        "bn1_gamma": 1.0 + 0.1 * jax.random.normal(ks[2], (C1,), jnp.float32),
        "bn1_beta": 0.1 * jax.random.normal(ks[3], (C1,), jnp.float32),
        "fc_w": 0.05 * jax.random.normal(ks[4], (2 * M, Tp * C1), jnp.float32),
        "fc_b": 0.05 * jax.random.normal(ks[5], (2 * M,), jnp.float32),
    }
    x = jax.random.normal(ks[6], (B, 1, len_state), jnp.float32)

    prep = prepare_params(params, M, len_state)   # one-time prep, off the hot path
    fwd = jax.jit(functools.partial(dqn_forward, M=M))

    out = jax.block_until_ready(fwd(x, prep))
    assert out.shape == (B, 2 * M)

    ref = dqn_reference(x, params)
    if not jnp.allclose(out, ref, atol=1e-4, rtol=1e-4):
        raise AssertionError("Pallas kernel output mismatches pure-JAX reference")

    print("KERNEL_OK")
</pallas_src>

<mosaic_0001>
module attributes {stable_mosaic.version = 11 : i64} {
  func.func @_dqn_fused_kernel(%arg0: i32, %arg1: memref<29x2xf32, #tpu.memory_space<vmem>>, %arg2: memref<4x32xf32, #tpu.memory_space<vmem>>, %arg3: memref<14x32x128xf32, #tpu.memory_space<vmem>>, %arg4: memref<1x128xf32, #tpu.memory_space<vmem>>, %arg5: memref<2x128xf32, #tpu.memory_space<vmem>>) attributes {dimension_semantics = [#tpu.dimension_semantics<arbitrary>], iteration_bounds = array<i64: 1>, scalar_prefetch = 0 : i64, scratch_operands = 0 : i64, tpu.core_type = #tpu.core_type<tc>, window_params = [{pipeline_mode = #tpu.pipeline_mode<synchronous>, transform_indices = @transform_0, window_bounds = array<i64: 29, 2>}, {pipeline_mode = #tpu.pipeline_mode<synchronous>, transform_indices = @transform_1, window_bounds = array<i64: 4, 32>}, {pipeline_mode = #tpu.pipeline_mode<synchronous>, transform_indices = @transform_2, window_bounds = array<i64: 14, 32, 128>}, {pipeline_mode = #tpu.pipeline_mode<synchronous>, transform_indices = @transform_3, window_bounds = array<i64: 1, 128>}, {pipeline_mode = #tpu.pipeline_mode<synchronous>, transform_indices = @transform_4, window_bounds = array<i64: 2, 128>}]} {
    %c0 = arith.constant 0 : index
    %c0_0 = arith.constant 0 : index
    %0 = vector.load %arg2[%c0, %c0_0] : memref<4x32xf32, #tpu.memory_space<vmem>>, vector<1x32xf32>
    %c1 = arith.constant 1 : index
    %c0_1 = arith.constant 0 : index
    %1 = vector.load %arg2[%c1, %c0_1] : memref<4x32xf32, #tpu.memory_space<vmem>>, vector<1x32xf32>
    %c2 = arith.constant 2 : index
    %c0_2 = arith.constant 0 : index
    %2 = vector.load %arg2[%c2, %c0_2] : memref<4x32xf32, #tpu.memory_space<vmem>>, vector<1x32xf32>
    %c3 = arith.constant 3 : index
    %c0_3 = arith.constant 0 : index
    %3 = vector.load %arg2[%c3, %c0_3] : memref<4x32xf32, #tpu.memory_space<vmem>>, vector<1x32xf32>
    %c0_4 = arith.constant 0 : index
    %c0_5 = arith.constant 0 : index
    %4 = vector.load %arg1[%c0_4, %c0_5] : memref<29x2xf32, #tpu.memory_space<vmem>>, vector<28x1xf32>
    %c1_6 = arith.constant 1 : index
    %c0_7 = arith.constant 0 : index
    %5 = vector.load %arg1[%c1_6, %c0_7] : memref<29x2xf32, #tpu.memory_space<vmem>>, vector<28x1xf32>
    %6 = vector.broadcast %4 : vector<28x1xf32> to vector<28x32xf32>
    %7 = vector.broadcast %0 : vector<1x32xf32> to vector<28x32xf32>
    %8 = arith.mulf %6, %7 : vector<28x32xf32>
    %9 = vector.broadcast %5 : vector<28x1xf32> to vector<28x32xf32>
    %10 = vector.broadcast %1 : vector<1x32xf32> to vector<28x32xf32>
    %11 = arith.mulf %9, %10 : vector<28x32xf32>
    %12 = arith.addf %8, %11 : vector<28x32xf32>
    %c0_8 = arith.constant 0 : index
    %c1_9 = arith.constant 1 : index
    %13 = vector.load %arg1[%c0_8, %c1_9] : memref<29x2xf32, #tpu.memory_space<vmem>>, vector<28x1xf32>
    %c1_10 = arith.constant 1 : index
    %c1_11 = arith.constant 1 : index
    %14 = vector.load %arg1[%c1_10, %c1_11] : memref<29x2xf32, #tpu.memory_space<vmem>>, vector<28x1xf32>
    %15 = vector.broadcast %13 : vector<28x1xf32> to vector<28x32xf32>
    %16 = vector.broadcast %0 : vector<1x32xf32> to vector<28x32xf32>
    %17 = arith.mulf %15, %16 : vector<28x32xf32>
    %18 = vector.broadcast %14 : vector<28x1xf32> to vector<28x32xf32>
    %19 = vector.broadcast %1 : vector<1x32xf32> to vector<28x32xf32>
    %20 = arith.mulf %18, %19 : vector<28x32xf32>
    %21 = arith.addf %17, %20 : vector<28x32xf32>
    %22 = tpu.concatenate %12, %21 in 0 : vector<28x32xf32>, vector<28x32xf32> -> vector<56x32xf32>
    %cst = arith.constant dense<0.000000e+00> : vector<32xf32>
    %23 = vector.multi_reduction <add>, %22, %cst [0] : vector<56x32xf32> to vector<32xf32>
    %24 = vector.shape_cast %23 : vector<32xf32> to vector<1x32xf32>
    %cst_12 = arith.constant 5.600000e+01 : f32
    %25 = vector.broadcast %cst_12 : f32 to vector<1x32xf32>
    %26 = arith.divf %24, %25 : vector<1x32xf32>
    %27 = vector.broadcast %26 : vector<1x32xf32> to vector<56x32xf32>
    %28 = arith.subf %22, %27 : vector<56x32xf32>
    %29 = arith.mulf %28, %28 : vector<56x32xf32>
    %cst_13 = arith.constant dense<0.000000e+00> : vector<32xf32>
    %30 = vector.multi_reduction <add>, %29, %cst_13 [0] : vector<56x32xf32> to vector<32xf32>
    %31 = vector.shape_cast %30 : vector<32xf32> to vector<1x32xf32>
    %cst_14 = arith.constant 5.600000e+01 : f32
    %32 = vector.broadcast %cst_14 : f32 to vector<1x32xf32>
    %33 = arith.divf %31, %32 : vector<1x32xf32>
    %34 = vector.broadcast %26 : vector<1x32xf32> to vector<56x32xf32>
    %35 = arith.subf %22, %34 : vector<56x32xf32>
    %cst_15 = arith.constant 9.99999974E-6 : f32
    %36 = vector.broadcast %cst_15 : f32 to vector<1x32xf32>
    %37 = arith.addf %33, %36 : vector<1x32xf32>
    %38 = math.rsqrt %37 : vector<1x32xf32>
    %39 = vector.broadcast %38 : vector<1x32xf32> to vector<56x32xf32>
    %40 = arith.mulf %35, %39 : vector<56x32xf32>
    %41 = vector.broadcast %2 : vector<1x32xf32> to vector<56x32xf32>
    %42 = arith.mulf %40, %41 : vector<56x32xf32>
    %43 = vector.broadcast %3 : vector<1x32xf32> to vector<56x32xf32>
    %44 = arith.addf %42, %43 : vector<56x32xf32>
    %cst_16 = arith.constant 0.000000e+00 : f32
    %45 = vector.broadcast %cst_16 : f32 to vector<56x32xf32>
    %46 = arith.maximumf %44, %45 : vector<56x32xf32>
    %c0_17 = arith.constant 0 : index
    %c0_18 = arith.constant 0 : index
    %47 = vector.load %arg4[%c0_17, %c0_18] : memref<1x128xf32, #tpu.memory_space<vmem>>, vector<1x128xf32>
    %c0_19 = arith.constant 0 : index
    %c0_20 = arith.constant 0 : index
    %48 = vector.load %arg4[%c0_19, %c0_20] : memref<1x128xf32, #tpu.memory_space<vmem>>, vector<1x128xf32>
    %c0_21 = arith.constant 0 : index
    %c0_22 = arith.constant 0 : index
    %c0_23 = arith.constant 0 : index
    %49 = vector.load %arg3[%c0_21, %c0_22, %c0_23] : memref<14x32x128xf32, #tpu.memory_space<vmem>>, vector<1x32x128xf32>
    %50 = vector.shape_cast %49 : vector<1x32x128xf32> to vector<32x128xf32>
    %51 = vector.extract_strided_slice %46 {offsets = [0, 0], sizes = [2, 32], strides = [1, 1]} : vector<56x32xf32> to vector<2x32xf32>
    %cst_24 = arith.constant dense<0xFF800000> : vector<32xf32>
    %52 = vector.multi_reduction <maximumf>, %51, %cst_24 [0] : vector<2x32xf32> to vector<32xf32>
    %53 = vector.shape_cast %52 : vector<32xf32> to vector<1x32xf32>
    %cst_25 = arith.constant dense<0.000000e+00> : vector<1x128xf32>
    %54 = tpu.matmul %53, %50, %cst_25 {dimension_numbers = #tpu.dot_dimension_numbers<[1], [0], [0], [1], [0, 0, 1, 1], [], []>} : vector<1x32xf32>, vector<32x128xf32>, vector<1x128xf32> -> vector<1x128xf32>
    %55 = arith.addf %47, %54 : vector<1x128xf32>
    %56 = vector.extract_strided_slice %46 {offsets = [28, 0], sizes = [2, 32], strides = [1, 1]} : vector<56x32xf32> to vector<2x32xf32>
    %cst_26 = arith.constant dense<0xFF800000> : vector<32xf32>
    %57 = vector.multi_reduction <maximumf>, %56, %cst_26 [0] : vector<2x32xf32> to vector<32xf32>
    %58 = vector.shape_cast %57 : vector<32xf32> to vector<1x32xf32>
    %cst_27 = arith.constant dense<0.000000e+00> : vector<1x128xf32>
    %59 = tpu.matmul %58, %50, %cst_27 {dimension_numbers = #tpu.dot_dimension_numbers<[1], [0], [0], [1], [0, 0, 1, 1], [], []>} : vector<1x32xf32>, vector<32x128xf32>, vector<1x128xf32> -> vector<1x128xf32>
    %60 = arith.addf %48, %59 : vector<1x128xf32>
    %c1_28 = arith.constant 1 : index
    %c0_29 = arith.constant 0 : index
    %c0_30 = arith.constant 0 : index
    %61 = vector.load %arg3[%c1_28, %c0_29, %c0_30] : memref<14x32x128xf32, #tpu.memory_space<vmem>>, vector<1x32x128xf32>
    %62 = vector.shape_cast %61 : vector<1x32x128xf32> to vector<32x128xf32>
    %63 = vector.extract_strided_slice %46 {offsets = [2, 0], sizes = [2, 32], strides = [1, 1]} : vector<56x32xf32> to vector<2x32xf32>
    %cst_31 = arith.constant dense<0xFF800000> : vector<32xf32>
    %64 = vector.multi_reduction <maximumf>, %63, %cst_31 [0] : vector<2x32xf32> to vector<32xf32>
    %65 = vector.shape_cast %64 : vector<32xf32> to vector<1x32xf32>
    %cst_32 = arith.constant dense<0.000000e+00> : vector<1x128xf32>
    %66 = tpu.matmul %65, %62, %cst_32 {dimension_numbers = #tpu.dot_dimension_numbers<[1], [0], [0], [1], [0, 0, 1, 1], [], []>} : vector<1x32xf32>, vector<32x128xf32>, vector<1x128xf32> -> vector<1x128xf32>
    %67 = arith.addf %55, %66 : vector<1x128xf32>
    %68 = vector.extract_strided_slice %46 {offsets = [30, 0], sizes = [2, 32], strides = [1, 1]} : vector<56x32xf32> to vector<2x32xf32>
    %cst_33 = arith.constant dense<0xFF800000> : vector<32xf32>
    %69 = vector.multi_reduction <maximumf>, %68, %cst_33 [0] : vector<2x32xf32> to vector<32xf32>
    %70 = vector.shape_cast %69 : vector<32xf32> to vector<1x32xf32>
    %cst_34 = arith.constant dense<0.000000e+00> : vector<1x128xf32>
    %71 = tpu.matmul %70, %62, %cst_34 {dimension_numbers = #tpu.dot_dimension_numbers<[1], [0], [0], [1], [0, 0, 1, 1], [], []>} : vector<1x32xf32>, vector<32x128xf32>, vector<1x128xf32> -> vector<1x128xf32>
    %72 = arith.addf %60, %71 : vector<1x128xf32>
    %c2_35 = arith.constant 2 : index
    %c0_36 = arith.constant 0 : index
    %c0_37 = arith.constant 0 : index
    %73 = vector.load %arg3[%c2_35, %c0_36, %c0_37] : memref<14x32x128xf32, #tpu.memory_space<vmem>>, vector<1x32x128xf32>
    %74 = vector.shape_cast %73 : vector<1x32x128xf32> to vector<32x128xf32>
    %75 = vector.extract_strided_slice %46 {offsets = [4, 0], sizes = [2, 32], strides = [1, 1]} : vector<56x32xf32> to vector<2x32xf32>
    %cst_38 = arith.constant dense<0xFF800000> : vector<32xf32>
    %76 = vector.multi_reduction <maximumf>, %75, %cst_38 [0] : vector<2x32xf32> to vector<32xf32>
    %77 = vector.shape_cast %76 : vector<32xf32> to vector<1x32xf32>
    %cst_39 = arith.constant dense<0.000000e+00> : vector<1x128xf32>
    %78 = tpu.matmul %77, %74, %cst_39 {dimension_numbers = #tpu.dot_dimension_numbers<[1], [0], [0], [1], [0, 0, 1, 1], [], []>} : vector<1x32xf32>, vector<32x128xf32>, vector<1x128xf32> -> vector<1x128xf32>
    %79 = arith.addf %67, %78 : vector<1x128xf32>
    %80 = vector.extract_strided_slice %46 {offsets = [32, 0], sizes = [2, 32], strides = [1, 1]} : vector<56x32xf32> to vector<2x32xf32>
    %cst_40 = arith.constant dense<0xFF800000> : vector<32xf32>
    %81 = vector.multi_reduction <maximumf>, %80, %cst_40 [0] : vector<2x32xf32> to vector<32xf32>
    %82 = vector.shape_cast %81 : vector<32xf32> to vector<1x32xf32>
    %cst_41 = arith.constant dense<0.000000e+00> : vector<1x128xf32>
    %83 = tpu.matmul %82, %74, %cst_41 {dimension_numbers = #tpu.dot_dimension_numbers<[1], [0], [0], [1], [0, 0, 1, 1], [], []>} : vector<1x32xf32>, vector<32x128xf32>, vector<1x128xf32> -> vector<1x128xf32>
    %84 = arith.addf %72, %83 : vector<1x128xf32>
    %c3_42 = arith.constant 3 : index
    %c0_43 = arith.constant 0 : index
    %c0_44 = arith.constant 0 : index
    %85 = vector.load %arg3[%c3_42, %c0_43, %c0_44] : memref<14x32x128xf32, #tpu.memory_space<vmem>>, vector<1x32x128xf32>
    %86 = vector.shape_cast %85 : vector<1x32x128xf32> to vector<32x128xf32>
    %87 = vector.extract_strided_slice %46 {offsets = [6, 0], sizes = [2, 32], strides = [1, 1]} : vector<56x32xf32> to vector<2x32xf32>
    %cst_45 = arith.constant dense<0xFF800000> : vector<32xf32>
    %88 = vector.multi_reduction <maximumf>, %87, %cst_45 [0] : vector<2x32xf32> to vector<32xf32>
    %89 = vector.shape_cast %88 : vector<32xf32> to vector<1x32xf32>
    %cst_46 = arith.constant dense<0.000000e+00> : vector<1x128xf32>
    %90 = tpu.matmul %89, %86, %cst_46 {dimension_numbers = #tpu.dot_dimension_numbers<[1], [0], [0], [1], [0, 0, 1, 1], [], []>} : vector<1x32xf32>, vector<32x128xf32>, vector<1x128xf32> -> vector<1x128xf32>
    %91 = arith.addf %79, %90 : vector<1x128xf32>
    %92 = vector.extract_strided_slice %46 {offsets = [34, 0], sizes = [2, 32], strides = [1, 1]} : vector<56x32xf32> to vector<2x32xf32>
    %cst_47 = arith.constant dense<0xFF800000> : vector<32xf32>
    %93 = vector.multi_reduction <maximumf>, %92, %cst_47 [0] : vector<2x32xf32> to vector<32xf32>
    %94 = vector.shape_cast %93 : vector<32xf32> to vector<1x32xf32>
    %cst_48 = arith.constant dense<0.000000e+00> : vector<1x128xf32>
    %95 = tpu.matmul %94, %86, %cst_48 {dimension_numbers = #tpu.dot_dimension_numbers<[1], [0], [0], [1], [0, 0, 1, 1], [], []>} : vector<1x32xf32>, vector<32x128xf32>, vector<1x128xf32> -> vector<1x128xf32>
    %96 = arith.addf %84, %95 : vector<1x128xf32>
    %c4 = arith.constant 4 : index
    %c0_49 = arith.constant 0 : index
    %c0_50 = arith.constant 0 : index
    %97 = vector.load %arg3[%c4, %c0_49, %c0_50] : memref<14x32x128xf32, #tpu.memory_space<vmem>>, vector<1x32x128xf32>
    %98 = vector.shape_cast %97 : vector<1x32x128xf32> to vector<32x128xf32>
    %99 = vector.extract_strided_slice %46 {offsets = [8, 0], sizes = [2, 32], strides = [1, 1]} : vector<56x32xf32> to vector<2x32xf32>
    %cst_51 = arith.constant dense<0xFF800000> : vector<32xf32>
    %100 = vector.multi_reduction <maximumf>, %99, %cst_51 [0] : vector<2x32xf32> to vector<32xf32>
    %101 = vector.shape_cast %100 : vector<32xf32> to vector<1x32xf32>
    %cst_52 = arith.constant dense<0.000000e+00> : vector<1x128xf32>
    %102 = tpu.matmul %101, %98, %cst_52 {dimension_numbers = #tpu.dot_dimension_numbers<[1], [0], [0], [1], [0, 0, 1, 1], [], []>} : vector<1x32xf32>, vector<32x128xf32>, vector<1x128xf32> -> vector<1x128xf32>
    %103 = arith.addf %91, %102 : vector<1x128xf32>
    %104 = vector.extract_strided_slice %46 {offsets = [36, 0], sizes = [2, 32], strides = [1, 1]} : vector<56x32xf32> to vector<2x32xf32>
    %cst_53 = arith.constant dense<0xFF800000> : vector<32xf32>
    %105 = vector.multi_reduction <maximumf>, %104, %cst_53 [0] : vector<2x32xf32> to vector<32xf32>
    %106 = vector.shape_cast %105 : vector<32xf32> to vector<1x32xf32>
    %cst_54 = arith.constant dense<0.000000e+00> : vector<1x128xf32>
    %107 = tpu.matmul %106, %98, %cst_54 {dimension_numbers = #tpu.dot_dimension_numbers<[1], [0], [0], [1], [0, 0, 1, 1], [], []>} : vector<1x32xf32>, vector<32x128xf32>, vector<1x128xf32> -> vector<1x128xf32>
    %108 = arith.addf %96, %107 : vector<1x128xf32>
    %c5 = arith.constant 5 : index
    %c0_55 = arith.constant 0 : index
    %c0_56 = arith.constant 0 : index
    %109 = vector.load %arg3[%c5, %c0_55, %c0_56] : memref<14x32x128xf32, #tpu.memory_space<vmem>>, vector<1x32x128xf32>
    %110 = vector.shape_cast %109 : vector<1x32x128xf32> to vector<32x128xf32>
    %111 = vector.extract_strided_slice %46 {offsets = [10, 0], sizes = [2, 32], strides = [1, 1]} : vector<56x32xf32> to vector<2x32xf32>
    %cst_57 = arith.constant dense<0xFF800000> : vector<32xf32>
    %112 = vector.multi_reduction <maximumf>, %111, %cst_57 [0] : vector<2x32xf32> to vector<32xf32>
    %113 = vector.shape_cast %112 : vector<32xf32> to vector<1x32xf32>
    %cst_58 = arith.constant dense<0.000000e+00> : vector<1x128xf32>
    %114 = tpu.matmul %113, %110, %cst_58 {dimension_numbers = #tpu.dot_dimension_numbers<[1], [0], [0], [1], [0, 0, 1, 1], [], []>} : vector<1x32xf32>, vector<32x128xf32>, vector<1x128xf32> -> vector<1x128xf32>
    %115 = arith.addf %103, %114 : vector<1x128xf32>
    %116 = vector.extract_strided_slice %46 {offsets = [38, 0], sizes = [2, 32], strides = [1, 1]} : vector<56x32xf32> to vector<2x32xf32>
    %cst_59 = arith.constant dense<0xFF800000> : vector<32xf32>
    %117 = vector.multi_reduction <maximumf>, %116, %cst_59 [0] : vector<2x32xf32> to vector<32xf32>
    %118 = vector.shape_cast %117 : vector<32xf32> to vector<1x32xf32>
    %cst_60 = arith.constant dense<0.000000e+00> : vector<1x128xf32>
    %119 = tpu.matmul %118, %110, %cst_60 {dimension_numbers = #tpu.dot_dimension_numbers<[1], [0], [0], [1], [0, 0, 1, 1], [], []>} : vector<1x32xf32>, vector<32x128xf32>, vector<1x128xf32> -> vector<1x128xf32>
    %120 = arith.addf %108, %119 : vector<1x128xf32>
    %c6 = arith.constant 6 : index
    %c0_61 = arith.constant 0 : index
    %c0_62 = arith.constant 0 : index
    %121 = vector.load %arg3[%c6, %c0_61, %c0_62] : memref<14x32x128xf32, #tpu.memory_space<vmem>>, vector<1x32x128xf32>
    %122 = vector.shape_cast %121 : vector<1x32x128xf32> to vector<32x128xf32>
    %123 = vector.extract_strided_slice %46 {offsets = [12, 0], sizes = [2, 32], strides = [1, 1]} : vector<56x32xf32> to vector<2x32xf32>
    %cst_63 = arith.constant dense<0xFF800000> : vector<32xf32>
    %124 = vector.multi_reduction <maximumf>, %123, %cst_63 [0] : vector<2x32xf32> to vector<32xf32>
    %125 = vector.shape_cast %124 : vector<32xf32> to vector<1x32xf32>
    %cst_64 = arith.constant dense<0.000000e+00> : vector<1x128xf32>
    %126 = tpu.matmul %125, %122, %cst_64 {dimension_numbers = #tpu.dot_dimension_numbers<[1], [0], [0], [1], [0, 0, 1, 1], [], []>} : vector<1x32xf32>, vector<32x128xf32>, vector<1x128xf32> -> vector<1x128xf32>
    %127 = arith.addf %115, %126 : vector<1x128xf32>
    %128 = vector.extract_strided_slice %46 {offsets = [40, 0], sizes = [2, 32], strides = [1, 1]} : vector<56x32xf32> to vector<2x32xf32>
    %cst_65 = arith.constant dense<0xFF800000> : vector<32xf32>
    %129 = vector.multi_reduction <maximumf>, %128, %cst_65 [0] : vector<2x32xf32> to vector<32xf32>
    %130 = vector.shape_cast %129 : vector<32xf32> to vector<1x32xf32>
    %cst_66 = arith.constant dense<0.000000e+00> : vector<1x128xf32>
    %131 = tpu.matmul %130, %122, %cst_66 {dimension_numbers = #tpu.dot_dimension_numbers<[1], [0], [0], [1], [0, 0, 1, 1], [], []>} : vector<1x32xf32>, vector<32x128xf32>, vector<1x128xf32> -> vector<1x128xf32>
    %132 = arith.addf %120, %131 : vector<1x128xf32>
    %c7 = arith.constant 7 : index
    %c0_67 = arith.constant 0 : index
    %c0_68 = arith.constant 0 : index
    %133 = vector.load %arg3[%c7, %c0_67, %c0_68] : memref<14x32x128xf32, #tpu.memory_space<vmem>>, vector<1x32x128xf32>
    %134 = vector.shape_cast %133 : vector<1x32x128xf32> to vector<32x128xf32>
    %135 = vector.extract_strided_slice %46 {offsets = [14, 0], sizes = [2, 32], strides = [1, 1]} : vector<56x32xf32> to vector<2x32xf32>
    %cst_69 = arith.constant dense<0xFF800000> : vector<32xf32>
    %136 = vector.multi_reduction <maximumf>, %135, %cst_69 [0] : vector<2x32xf32> to vector<32xf32>
    %137 = vector.shape_cast %136 : vector<32xf32> to vector<1x32xf32>
    %cst_70 = arith.constant dense<0.000000e+00> : vector<1x128xf32>
    %138 = tpu.matmul %137, %134, %cst_70 {dimension_numbers = #tpu.dot_dimension_numbers<[1], [0], [0], [1], [0, 0, 1, 1], [], []>} : vector<1x32xf32>, vector<32x128xf32>, vector<1x128xf32> -> vector<1x128xf32>
    %139 = arith.addf %127, %138 : vector<1x128xf32>
    %140 = vector.extract_strided_slice %46 {offsets = [42, 0], sizes = [2, 32], strides = [1, 1]} : vector<56x32xf32> to vector<2x32xf32>
    %cst_71 = arith.constant dense<0xFF800000> : vector<32xf32>
    %141 = vector.multi_reduction <maximumf>, %140, %cst_71 [0] : vector<2x32xf32> to vector<32xf32>
    %142 = vector.shape_cast %141 : vector<32xf32> to vector<1x32xf32>
    %cst_72 = arith.constant dense<0.000000e+00> : vector<1x128xf32>
    %143 = tpu.matmul %142, %134, %cst_72 {dimension_numbers = #tpu.dot_dimension_numbers<[1], [0], [0], [1], [0, 0, 1, 1], [], []>} : vector<1x32xf32>, vector<32x128xf32>, vector<1x128xf32> -> vector<1x128xf32>
    %144 = arith.addf %132, %143 : vector<1x128xf32>
    %c8 = arith.constant 8 : index
    %c0_73 = arith.constant 0 : index
    %c0_74 = arith.constant 0 : index
    %145 = vector.load %arg3[%c8, %c0_73, %c0_74] : memref<14x32x128xf32, #tpu.memory_space<vmem>>, vector<1x32x128xf32>
    %146 = vector.shape_cast %145 : vector<1x32x128xf32> to vector<32x128xf32>
    %147 = vector.extract_strided_slice %46 {offsets = [16, 0], sizes = [2, 32], strides = [1, 1]} : vector<56x32xf32> to vector<2x32xf32>
    %cst_75 = arith.constant dense<0xFF800000> : vector<32xf32>
    %148 = vector.multi_reduction <maximumf>, %147, %cst_75 [0] : vector<2x32xf32> to vector<32xf32>
    %149 = vector.shape_cast %148 : vector<32xf32> to vector<1x32xf32>
    %cst_76 = arith.constant dense<0.000000e+00> : vector<1x128xf32>
    %150 = tpu.matmul %149, %146, %cst_76 {dimension_numbers = #tpu.dot_dimension_numbers<[1], [0], [0], [1], [0, 0, 1, 1], [], []>} : vector<1x32xf32>, vector<32x128xf32>, vector<1x128xf32> -> vector<1x128xf32>
    %151 = arith.addf %139, %150 : vector<1x128xf32>
    %152 = vector.extract_strided_slice %46 {offsets = [44, 0], sizes = [2, 32], strides = [1, 1]} : vector<56x32xf32> to vector<2x32xf32>
    %cst_77 = arith.constant dense<0xFF800000> : vector<32xf32>
    %153 = vector.multi_reduction <maximumf>, %152, %cst_77 [0] : vector<2x32xf32> to vector<32xf32>
    %154 = vector.shape_cast %153 : vector<32xf32> to vector<1x32xf32>
    %cst_78 = arith.constant dense<0.000000e+00> : vector<1x128xf32>
    %155 = tpu.matmul %154, %146, %cst_78 {dimension_numbers = #tpu.dot_dimension_numbers<[1], [0], [0], [1], [0, 0, 1, 1], [], []>} : vector<1x32xf32>, vector<32x128xf32>, vector<1x128xf32> -> vector<1x128xf32>
    %156 = arith.addf %144, %155 : vector<1x128xf32>
    %c9 = arith.constant 9 : index
    %c0_79 = arith.constant 0 : index
    %c0_80 = arith.constant 0 : index
    %157 = vector.load %arg3[%c9, %c0_79, %c0_80] : memref<14x32x128xf32, #tpu.memory_space<vmem>>, vector<1x32x128xf32>
    %158 = vector.shape_cast %157 : vector<1x32x128xf32> to vector<32x128xf32>
    %159 = vector.extract_strided_slice %46 {offsets = [18, 0], sizes = [2, 32], strides = [1, 1]} : vector<56x32xf32> to vector<2x32xf32>
    %cst_81 = arith.constant dense<0xFF800000> : vector<32xf32>
    %160 = vector.multi_reduction <maximumf>, %159, %cst_81 [0] : vector<2x32xf32> to vector<32xf32>
    %161 = vector.shape_cast %160 : vector<32xf32> to vector<1x32xf32>
    %cst_82 = arith.constant dense<0.000000e+00> : vector<1x128xf32>
    %162 = tpu.matmul %161, %158, %cst_82 {dimension_numbers = #tpu.dot_dimension_numbers<[1], [0], [0], [1], [0, 0, 1, 1], [], []>} : vector<1x32xf32>, vector<32x128xf32>, vector<1x128xf32> -> vector<1x128xf32>
    %163 = arith.addf %151, %162 : vector<1x128xf32>
    %164 = vector.extract_strided_slice %46 {offsets = [46, 0], sizes = [2, 32], strides = [1, 1]} : vector<56x32xf32> to vector<2x32xf32>
    %cst_83 = arith.constant dense<0xFF800000> : vector<32xf32>
    %165 = vector.multi_reduction <maximumf>, %164, %cst_83 [0] : vector<2x32xf32> to vector<32xf32>
    %166 = vector.shape_cast %165 : vector<32xf32> to vector<1x32xf32>
    %cst_84 = arith.constant dense<0.000000e+00> : vector<1x128xf32>
    %167 = tpu.matmul %166, %158, %cst_84 {dimension_numbers = #tpu.dot_dimension_numbers<[1], [0], [0], [1], [0, 0, 1, 1], [], []>} : vector<1x32xf32>, vector<32x128xf32>, vector<1x128xf32> -> vector<1x128xf32>
    %168 = arith.addf %156, %167 : vector<1x128xf32>
    %c10 = arith.constant 10 : index
    %c0_85 = arith.constant 0 : index
    %c0_86 = arith.constant 0 : index
    %169 = vector.load %arg3[%c10, %c0_85, %c0_86] : memref<14x32x128xf32, #tpu.memory_space<vmem>>, vector<1x32x128xf32>
    %170 = vector.shape_cast %169 : vector<1x32x128xf32> to vector<32x128xf32>
    %171 = vector.extract_strided_slice %46 {offsets = [20, 0], sizes = [2, 32], strides = [1, 1]} : vector<56x32xf32> to vector<2x32xf32>
    %cst_87 = arith.constant dense<0xFF800000> : vector<32xf32>
    %172 = vector.multi_reduction <maximumf>, %171, %cst_87 [0] : vector<2x32xf32> to vector<32xf32>
    %173 = vector.shape_cast %172 : vector<32xf32> to vector<1x32xf32>
    %cst_88 = arith.constant dense<0.000000e+00> : vector<1x128xf32>
    %174 = tpu.matmul %173, %170, %cst_88 {dimension_numbers = #tpu.dot_dimension_numbers<[1], [0], [0], [1], [0, 0, 1, 1], [], []>} : vector<1x32xf32>, vector<32x128xf32>, vector<1x128xf32> -> vector<1x128xf32>
    %175 = arith.addf %163, %174 : vector<1x128xf32>
    %176 = vector.extract_strided_slice %46 {offsets = [48, 0], sizes = [2, 32], strides = [1, 1]} : vector<56x32xf32> to vector<2x32xf32>
    %cst_89 = arith.constant dense<0xFF800000> : vector<32xf32>
    %177 = vector.multi_reduction <maximumf>, %176, %cst_89 [0] : vector<2x32xf32> to vector<32xf32>
    %178 = vector.shape_cast %177 : vector<32xf32> to vector<1x32xf32>
    %cst_90 = arith.constant dense<0.000000e+00> : vector<1x128xf32>
    %179 = tpu.matmul %178, %170, %cst_90 {dimension_numbers = #tpu.dot_dimension_numbers<[1], [0], [0], [1], [0, 0, 1, 1], [], []>} : vector<1x32xf32>, vector<32x128xf32>, vector<1x128xf32> -> vector<1x128xf32>
    %180 = arith.addf %168, %179 : vector<1x128xf32>
    %c11 = arith.constant 11 : index
    %c0_91 = arith.constant 0 : index
    %c0_92 = arith.constant 0 : index
    %181 = vector.load %arg3[%c11, %c0_91, %c0_92] : memref<14x32x128xf32, #tpu.memory_space<vmem>>, vector<1x32x128xf32>
    %182 = vector.shape_cast %181 : vector<1x32x128xf32> to vector<32x128xf32>
    %183 = vector.extract_strided_slice %46 {offsets = [22, 0], sizes = [2, 32], strides = [1, 1]} : vector<56x32xf32> to vector<2x32xf32>
    %cst_93 = arith.constant dense<0xFF800000> : vector<32xf32>
    %184 = vector.multi_reduction <maximumf>, %183, %cst_93 [0] : vector<2x32xf32> to vector<32xf32>
    %185 = vector.shape_cast %184 : vector<32xf32> to vector<1x32xf32>
    %cst_94 = arith.constant dense<0.000000e+00> : vector<1x128xf32>
    %186 = tpu.matmul %185, %182, %cst_94 {dimension_numbers = #tpu.dot_dimension_numbers<[1], [0], [0], [1], [0, 0, 1, 1], [], []>} : vector<1x32xf32>, vector<32x128xf32>, vector<1x128xf32> -> vector<1x128xf32>
    %187 = arith.addf %175, %186 : vector<1x128xf32>
    %188 = vector.extract_strided_slice %46 {offsets = [50, 0], sizes = [2, 32], strides = [1, 1]} : vector<56x32xf32> to vector<2x32xf32>
    %cst_95 = arith.constant dense<0xFF800000> : vector<32xf32>
    %189 = vector.multi_reduction <maximumf>, %188, %cst_95 [0] : vector<2x32xf32> to vector<32xf32>
    %190 = vector.shape_cast %189 : vector<32xf32> to vector<1x32xf32>
    %cst_96 = arith.constant dense<0.000000e+00> : vector<1x128xf32>
    %191 = tpu.matmul %190, %182, %cst_96 {dimension_numbers = #tpu.dot_dimension_numbers<[1], [0], [0], [1], [0, 0, 1, 1], [], []>} : vector<1x32xf32>, vector<32x128xf32>, vector<1x128xf32> -> vector<1x128xf32>
    %192 = arith.addf %180, %191 : vector<1x128xf32>
    %c12 = arith.constant 12 : index
    %c0_97 = arith.constant 0 : index
    %c0_98 = arith.constant 0 : index
    %193 = vector.load %arg3[%c12, %c0_97, %c0_98] : memref<14x32x128xf32, #tpu.memory_space<vmem>>, vector<1x32x128xf32>
    %194 = vector.shape_cast %193 : vector<1x32x128xf32> to vector<32x128xf32>
    %195 = vector.extract_strided_slice %46 {offsets = [24, 0], sizes = [2, 32], strides = [1, 1]} : vector<56x32xf32> to vector<2x32xf32>
    %cst_99 = arith.constant dense<0xFF800000> : vector<32xf32>
    %196 = vector.multi_reduction <maximumf>, %195, %cst_99 [0] : vector<2x32xf32> to vector<32xf32>
    %197 = vector.shape_cast %196 : vector<32xf32> to vector<1x32xf32>
    %cst_100 = arith.constant dense<0.000000e+00> : vector<1x128xf32>
    %198 = tpu.matmul %197, %194, %cst_100 {dimension_numbers = #tpu.dot_dimension_numbers<[1], [0], [0], [1], [0, 0, 1, 1], [], []>} : vector<1x32xf32>, vector<32x128xf32>, vector<1x128xf32> -> vector<1x128xf32>
    %199 = arith.addf %187, %198 : vector<1x128xf32>
    %200 = vector.extract_strided_slice %46 {offsets = [52, 0], sizes = [2, 32], strides = [1, 1]} : vector<56x32xf32> to vector<2x32xf32>
    %cst_101 = arith.constant dense<0xFF800000> : vector<32xf32>
    %201 = vector.multi_reduction <maximumf>, %200, %cst_101 [0] : vector<2x32xf32> to vector<32xf32>
    %202 = vector.shape_cast %201 : vector<32xf32> to vector<1x32xf32>
    %cst_102 = arith.constant dense<0.000000e+00> : vector<1x128xf32>
    %203 = tpu.matmul %202, %194, %cst_102 {dimension_numbers = #tpu.dot_dimension_numbers<[1], [0], [0], [1], [0, 0, 1, 1], [], []>} : vector<1x32xf32>, vector<32x128xf32>, vector<1x128xf32> -> vector<1x128xf32>
    %204 = arith.addf %192, %203 : vector<1x128xf32>
    %c13 = arith.constant 13 : index
    %c0_103 = arith.constant 0 : index
    %c0_104 = arith.constant 0 : index
    %205 = vector.load %arg3[%c13, %c0_103, %c0_104] : memref<14x32x128xf32, #tpu.memory_space<vmem>>, vector<1x32x128xf32>
    %206 = vector.shape_cast %205 : vector<1x32x128xf32> to vector<32x128xf32>
    %207 = vector.extract_strided_slice %46 {offsets = [26, 0], sizes = [2, 32], strides = [1, 1]} : vector<56x32xf32> to vector<2x32xf32>
    %cst_105 = arith.constant dense<0xFF800000> : vector<32xf32>
    %208 = vector.multi_reduction <maximumf>, %207, %cst_105 [0] : vector<2x32xf32> to vector<32xf32>
    %209 = vector.shape_cast %208 : vector<32xf32> to vector<1x32xf32>
    %cst_106 = arith.constant dense<0.000000e+00> : vector<1x128xf32>
    %210 = tpu.matmul %209, %206, %cst_106 {dimension_numbers = #tpu.dot_dimension_numbers<[1], [0], [0], [1], [0, 0, 1, 1], [], []>} : vector<1x32xf32>, vector<32x128xf32>, vector<1x128xf32> -> vector<1x128xf32>
    %211 = arith.addf %199, %210 : vector<1x128xf32>
    %212 = vector.extract_strided_slice %46 {offsets = [54, 0], sizes = [2, 32], strides = [1, 1]} : vector<56x32xf32> to vector<2x32xf32>
    %cst_107 = arith.constant dense<0xFF800000> : vector<32xf32>
    %213 = vector.multi_reduction <maximumf>, %212, %cst_107 [0] : vector<2x32xf32> to vector<32xf32>
    %214 = vector.shape_cast %213 : vector<32xf32> to vector<1x32xf32>
    %cst_108 = arith.constant dense<0.000000e+00> : vector<1x128xf32>
    %215 = tpu.matmul %214, %206, %cst_108 {dimension_numbers = #tpu.dot_dimension_numbers<[1], [0], [0], [1], [0, 0, 1, 1], [], []>} : vector<1x32xf32>, vector<32x128xf32>, vector<1x128xf32> -> vector<1x128xf32>
    %216 = arith.addf %204, %215 : vector<1x128xf32>
    %217 = tpu.concatenate %211, %216 in 0 : vector<1x128xf32>, vector<1x128xf32> -> vector<2x128xf32>
    %c0_109 = arith.constant 0 : index
    %c0_110 = arith.constant 0 : index
    %218 = vector.load %arg5[%c0_109, %c0_110] : memref<2x128xf32, #tpu.memory_space<vmem>>, vector<2x128xf32>
    tpu.vector_store %arg5[%c0_109, %c0_110], %217 {strides = array<i32>} : memref<2x128xf32, #tpu.memory_space<vmem>>, vector<2x128xf32>,
    return
  }
  func.func @transform_0(%arg0: i32) -> (i32, i32) {
    %c0_i32 = arith.constant 0 : i32
    %c0_i32_0 = arith.constant 0 : i32
    %c0_i32_1 = arith.constant 0 : i32
    return %c0_i32, %c0_i32_0 : i32, i32
  }
  func.func @transform_1(%arg0: i32) -> (i32, i32) {
    %c0_i32 = arith.constant 0 : i32
    %c0_i32_0 = arith.constant 0 : i32
    %c0_i32_1 = arith.constant 0 : i32
    return %c0_i32, %c0_i32_0 : i32, i32
  }
  func.func @transform_2(%arg0: i32) -> (i32, i32, i32) {
    %c0_i32 = arith.constant 0 : i32
    %c0_i32_0 = arith.constant 0 : i32
    %c0_i32_1 = arith.constant 0 : i32
    %c0_i32_2 = arith.constant 0 : i32
    return %c0_i32, %c0_i32_0, %c0_i32_1 : i32, i32, i32
  }
  func.func @transform_3(%arg0: i32) -> (i32, i32) {
    %c0_i32 = arith.constant 0 : i32
    %c0_i32_0 = arith.constant 0 : i32
    %c0_i32_1 = arith.constant 0 : i32
    return %c0_i32, %c0_i32_0 : i32, i32
  }
  func.func @transform_4(%arg0: i32) -> (i32, i32) {
    %c0_i32 = arith.constant 0 : i32
    %c0_i32_0 = arith.constant 0 : i32
    %c0_i32_1 = arith.constant 0 : i32
    return %c0_i32, %c0_i32_0 : i32, i32
  }
}

</mosaic_0001>

<bundles_post_ra>
// kernel: dqn_forward.1
= control target key start
LH: loop header
LB: loop body
LE: loop exit
PB: predicated region body
PF: predicated region fallthrough
CT: control target
= control target key end

     0   :  { %9 = vsyncpa [#allocation3], 0  ;;  %s3592_s0 = inlined_call_operand.vmem [shape: f32[29,2], index: 0, kind: input, shape index: {}]   ;;  %s3593_s1 = inlined_call_operand.vmem [shape: f32[4,32], index: 1, kind: input, shape index: {}]   ;;  %s3594_s2 = inlined_call_operand.hbm [shape: f32[14,32,128], index: 2, kind: input, shape index: {}]   ;;  %s3595_s3 = inlined_call_operand.vmem [shape: f32[1,128], index: 3, kind: input, shape index: {}]   ;;  %s3596_s4 = inlined_call_operand.hbm [shape: f32[2,128], index: 4, kind: output, shape index: {}]  }
   0x1   :  { %10 = vsyncpa [#allocation4], 0  ;;  %s3165_s15 = smov [#allocation2]  }
   0x2   :  { %s20_s16 = sshll.u32 %s3165_s15, 4  ;;  %s21_s16 = int_to_ptr.vmem [resolvable:$true] %s20_s16 }
   0x3   :  { %s3129_s17 = scalar_lea.vmem %s21_s16, 7168  ;;  %p3134_p1 = scmp.lt.s32.totalorder %s21_s16, %s21_s16 }
   0x4   :  { %p3130_p0 = scmp.ne.s32.totalorder %s21_s16, %s3129_s17  ;;  %p3135_p2 = scmp.lt.s32.totalorder %s3129_s17, %s3129_s17 }
   0x6   :  { %p3136_p3 = por %p3135_p2, %p3134_p1 }
   0x8   :  { %p3137_p4 = pnand %p3136_p3, %p3130_p0 }
   0xa   :  { %3140 = shalt.err (!%p3137_p4)
}
   0xb   :  { %s3166_s18 = smov 128   ;;  %s3167_s19 = smov 8  }
   0xc   :  { %26 = dma.hbm_to_vmem [thread:$0]  %s3594_s2, 7168, %s21_s16, [#allocation3], %s3166_s18, %s3166_s18, %s3167_s19  }
   0xd   :  { %3161 = dma.done.wait [#allocation3], 7168  }
   0xe   :  { %3162 = vsyncadd [#allocation3], 4294960128  ;;  %v3168_v0 = vmov 0   ;;  %v40_v1 = vld [vmem:[%s3592_s0 + $0x1] sm:$0xff]  ;;  %v41_v3 = vld [vmem:[%s3592_s0 + $0x9] sm:$0xff]  ;;  %v3169_v6 = vmov 1  }
   0xf   :  { %3114 = vset.pattern.permute.xlu1 %v3168_v0  ;;  %3113 = vset.pattern.permute.xlu0 %v3168_v0  ;;  %v36_v2 = vld [vmem:[%s3592_s0] sm:$0xff]  ;;  %v37_v4 = vld [vmem:[%s3592_s0 + $0x8] sm:$0xff]  ;;  %v42_v5 = vld [vmem:[%s3592_s0 + $0x11] sm:$0xff]  ;;  %v3170_v11 = vmov 0.0   ;;  %vm3171_vm0 = vmmov 0   ;;  %vm152_vm1 = vcmask 1043456  }
  0x10   :  { %74 = vperm.xlu1 %3114, %v40_v1   ;;  %46 = vperm.xlu0 %3113, %v36_v2   ;;  %v38_v7 = vld [vmem:[%s3592_s0 + $0x10] sm:$0xff]  ;;  %v39_v8 = vld [vmem:[%s3592_s0 + $0x18] sm:$0xf]  ;;  %v261_v13 = vld [vmem:[#allocation2 + $0x8] sm:$0xff]  ;;  %vm165_vm2 = vcmask 261120   ;;  %vm264_vm3 = vcmask 254976  }
  0x11   :  { %v43_v9 = vld [vmem:[%s3592_s0 + $0x19] sm:$0xf]  ;;  %2797 = vmatprep.subr.mxu0 %v3170_v11  ;;  %2808 = vmatprep.subr.mxu1 %v3170_v11  ;;  %v262_v12 = vld [vmem:[#allocation2 + $0x10] sm:$0xff]  ;;  %v260_v14 = vld [vmem:[#allocation2] sm:$0xff]  ;;  %vm346_vm4 = vcmask 259076   ;;  %vm433_vm5 = vcmask 257026  }
  0x12   :  { %v263_v10 = vld [vmem:[#allocation2 + $0x18] sm:$0xff]  ;;  %2805 = vmatprep.mubr.msk.f32.mxu0 %vm3171_vm0, %v3170_v11  ;;  %2816 = vmatprep.mubr.msk.f32.mxu1 %vm3171_vm0, %v3170_v11  ;;  %v2625_v24 = vld [vmem:[%s3593_s1] ss:$0 sm:$0xff]  ;;  %v2626_v26 = vld [vmem:[%s3593_s1 + $0x1] ss:$0 sm:$0xff]  ;;  %vm515_vm6 = vcmask 261126  }
  0x13   :  { %2798 = vmatpush3.msra.mxu0 %v263_v10  ;;  %2809 = vmatpush3.msra.mxu1 %v263_v10  ;;  %vm2607_vm7 = vcmask 1040384  }
  0x14   :  { %79 = vperm.xlu1 %3114, %v41_v3   ;;  %51 = vperm.xlu0 %3113, %v37_v4  }
  0x15   :  { %2799 = vmatprep.subr.mxu0 %v3170_v11  ;;  %2810 = vmatprep.subr.mxu1 %v3170_v11 }
  0x16   :  { %2800 = vmatpush3.msra.mxu0 %v262_v12  ;;  %2811 = vmatpush3.msra.mxu1 %v262_v12 }
  0x17   :  { %2801 = vmatprep.subr.mxu0 %v3170_v11  ;;  %2812 = vmatprep.subr.mxu1 %v3170_v11 }
  0x18   :  { %3115 = vset.pattern.permute.xlu1 %v3169_v6  ;;  %84 = vperm.xlu0 %3113, %v42_v5  }
  0x19   :  { %125 = vperm.xlu1 %3115, %v40_v1   ;;  %2802 = vmatpush3.msra.mxu0 %v261_v13 }
  0x1a   :  { %2813 = vmatpush3.msra.mxu1 %v261_v13  ;;  %2803 = vmatprep.subr.mxu0 %v3170_v11 }
  0x1b   :  { %2814 = vmatprep.subr.mxu1 %v3170_v11  ;;  %2804 = vmatpush3.msra.mxu0 %v260_v14 }
  0x1c   :  { %3117 = vset.pattern.permute.xlu0 %v3169_v6  ;;  %2815 = vmatpush3.msra.mxu1 %v260_v14 }
  0x1d   :  { %3116 = vset.pattern.permute.xlu1 %v3168_v0  ;;  %105 = vperm.xlu0 %3117, %v36_v2  }
  0x1e   :  { %56 = vperm.xlu1 %3116, %v38_v7   ;;  %2819 = vmatprep.subr.mxu0 %v3170_v11 }
  0x1f   :  { %2830 = vmatprep.subr.mxu1 %v3170_v11 }
  0x21   :  { %109 = vperm.xlu0 %3117, %v37_v4  }
  0x22   :  { %61 = vperm.xlu1 %3116, %v39_v8  }
  0x25   :  { %133 = vperm.xlu0 %3117, %v42_v5  }
  0x26   :  { %89 = vperm.xlu1 %3116, %v43_v9  }
  0x29   :  { %137 = vperm.xlu0 %3117, %v43_v9  }
  0x2a   :  { %3118 = vset.pattern.permute.xlu1 %v3169_v6 }
  0x2b   :  { %129 = vperm.xlu1 %3118, %v41_v3  }
  0x2f   :  { %113 = vperm.xlu1 %3118, %v38_v7  }
  0x33   :  { %117 = vperm.xlu1 %3118, %v39_v8  }
  0x8b   :  { %v75_v15 = vpop.permute.xlu1 %74  ;;  %v47_v16 = vpop.permute.xlu0 %46 }
  0x8c   :  { %v96_v33 = vmul.f32 %v2626_v26, %v75_v15  ;;  %v68_v34 = vmul.f32 %v2625_v24, %v47_v16 }
  0x8e   :  { %v100_v45 = vadd.f32 %v96_v33, %v68_v34 }
  0x8f   :  { %v80_v17 = vpop.permute.xlu1 %79  ;;  %v52_v18 = vpop.permute.xlu0 %51 }
  0x90   :  { %v97_v29 = vmul.f32 %v2626_v26, %v80_v17  ;;  %v69_v30 = vmul.f32 %v2625_v24, %v52_v18  ;;  %v166_v55 = vsel %vm165_vm2, %v100_v45, 0.0 }
  0x92   :  { %v101_v38 = vadd.f32 %v97_v29, %v69_v30 }
  0x93   :  { %v85_v20 = vpop.permute.xlu0 %84 }
  0x94   :  { %v126_v19 = vpop.permute.xlu1 %125  ;;  %v98_v39 = vmul.f32 %v2626_v26, %v85_v20  ;;  %v167_v49 = vsel %vm165_vm2, %v101_v38, 0.0 }
  0x95   :  { %v140_v31 = vmul.f32 %v2626_v26, %v126_v19  ;;  %v168_v58 = vadd.f32 %v167_v49, %v166_v55 }
  0x98   :  { %v106_v22 = vpop.permute.xlu0 %105 }
  0x99   :  { %v57_v21 = vpop.permute.xlu1 %56  ;;  %v120_v27 = vmul.f32 %v2625_v24, %v106_v22 }
  0x9a   :  { %v70_v35 = vmul.f32 %v2625_v24, %v57_v21 }
  0x9b   :  { %v144_v36 = vadd.f32 %v140_v31, %v120_v27 }
  0x9c   :  { %v110_v25 = vpop.permute.xlu0 %109  ;;  %v102_v46 = vadd.f32 %v98_v39, %v70_v35 }
  0x9d   :  { %v62_v23 = vpop.permute.xlu1 %61  ;;  %v121_v42 = vmul.f32 %v2625_v24, %v110_v25  ;;  %v153_v47 = vrot.slane %v144_v36, 4 }
  0x9e   :  { %v71_v37 = vmul.f32 %v2625_v24, %v62_v23  ;;  %v169_v56 = vsel %vm165_vm2, %v102_v46, 0.0 }
  0x9f   :  { %v170_v63 = vadd.f32 %v169_v56, %v168_v58  ;;  %v3270_v58 = vld [vmem:[%s3593_s1 + $0x2] ss:$0 sm:$0xff] }
  0xa0   :  { %v134_v40 = vpop.permute.xlu0 %133 }
  0xa1   :  { %v90_v28 = vpop.permute.xlu1 %89  ;;  %v142_v51 = vmul.f32 %v2626_v26, %v134_v40 }
  0xa2   :  { %v99_v32 = vmul.f32 %v2626_v26, %v90_v28 }
  0xa4   :  { %v103_v43 = vadd.f32 %v99_v32, %v71_v37  ;;  %v138_v57 = vpop.permute.xlu0 %137 }
  0xa5   :  { %v143_v0 = vmul.f32 %v2626_v26, %v138_v57 }
  0xa6   :  { %v130_v41 = vpop.permute.xlu1 %129  ;;  %v164_v52 = vsel %vm152_vm1, %v103_v43, %v153_v47 }
  0xa7   :  { %v141_v44 = vmul.f32 %v2626_v26, %v130_v41  ;;  %v171_v61 = vsel %vm165_vm2, %v164_v52, 0.0 }
  0xa8   :  { %v172_v4 = vadd.f32 %v171_v61, %v170_v63  ;;  %v3275_v63 = vld [vmem:[%s3593_s1 + $0x3] ss:$0 sm:$0xff] }
  0xa9   :  { %v145_v48 = vadd.f32 %v141_v44, %v121_v42 }
  0xaa   :  { %v114_v50 = vpop.permute.xlu1 %113 }
  0xab   :  { %v154_v53 = vrot.slane %v145_v48, 4  ;;  %v122_v54 = vmul.f32 %v2625_v24, %v114_v50 }
  0xad   :  { %v155_v59 = vsel %vm152_vm1, %v153_v47, %v154_v53  ;;  %v146_v60 = vadd.f32 %v142_v51, %v122_v54 }
  0xae   :  { %v118_v62 = vpop.permute.xlu1 %117  ;;  %v173_v3 = vsel %vm165_vm2, %v155_v59, 0.0 }
  0xaf   :  { %v156_v1 = vrot.slane %v146_v60, 4  ;;  %v123_v2 = vmul.f32 %v2625_v24, %v118_v62  ;;  %v174_v8 = vadd.f32 %v173_v3, %v172_v4 }
  0xb1   :  { %v157_v5 = vsel %vm152_vm1, %v154_v53, %v156_v1  ;;  %v147_v6 = vadd.f32 %v143_v0, %v123_v2 }
  0xb2   :  { %v175_v7 = vsel %vm165_vm2, %v157_v5, 0.0 }
  0xb3   :  { %v158_v9 = vrot.slane %v147_v6, 4  ;;  %v176_v10 = vadd.f32 %v175_v7, %v174_v8 }
  0xb5   :  { %v159_v12 = vsel %vm152_vm1, %v156_v1, %v158_v9 }
  0xb6   :  { %v177_v13 = vsel %vm165_vm2, %v159_v12, 0.0 }
  0xb7   :  { %v178_v14 = vadd.f32 %v177_v13, %v176_v10 }
  0xb9   :  { %v179_v15 = vrot.slane %v178_v14, 4 }
  0xbb   :  { %v180_v16 = vadd.f32 %v179_v15, %v178_v14 }
  0xbd   :  { %v181_v17 = vrot.slane %v180_v16, 2 }
  0xbf   :  { %v182_v18 = vadd.f32 %v181_v17, %v180_v16 }
  0xc1   :  { %v183_v19 = vrot.slane %v182_v18, 1 }
  0xc3   :  { %v184_v20 = vadd.f32 %v183_v19, %v182_v18 }
  0xc5   :  { %v186_v21 = vmul.f32 0.017857144, %v184_v20 }
  0xc7   :  { %v187_v22 = vsub.f32 %v100_v45, %v186_v21  ;;  %v3256_v23 = vsub.f32 %v101_v38, %v186_v21  ;;  %v189_v24 = vsub.f32 %v102_v46, %v186_v21  ;;  %v190_v25 = vsub.f32 %v164_v52, %v186_v21 }
  0xc8   :  { %v191_v26 = vsub.f32 %v155_v59, %v186_v21  ;;  %v192_v30 = vsub.f32 %v157_v5, %v186_v21  ;;  %v193_v35 = vsub.f32 %v159_v12, %v186_v21 }
  0xc9   :  { %v194_v27 = vmul.f32 %v187_v22, %v187_v22  ;;  %v195_v28 = vmul.f32 %v3256_v23, %v3256_v23  ;;  %v196_v29 = vmul.f32 %v189_v24, %v189_v24  ;;  %v197_v31 = vmul.f32 %v190_v25, %v190_v25 }
  0xca   :  { %v198_v36 = vmul.f32 %v191_v26, %v191_v26  ;;  %v199_v39 = vmul.f32 %v192_v30, %v192_v30  ;;  %v200_v42 = vmul.f32 %v193_v35, %v193_v35 }
  0xcb   :  { %v201_v32 = vsel %vm165_vm2, %v194_v27, 0.0  ;;  %v202_v33 = vsel %vm165_vm2, %v195_v28, 0.0  ;;  %v204_v37 = vsel %vm165_vm2, %v196_v29, 0.0  ;;  %v206_v40 = vsel %vm165_vm2, %v197_v31, 0.0 }
  0xcc   :  { %v203_v34 = vadd.f32 %v202_v33, %v201_v32  ;;  %v208_v43 = vsel %vm165_vm2, %v198_v36, 0.0  ;;  %v210_v45 = vsel %vm165_vm2, %v199_v39, 0.0  ;;  %v212_v47 = vsel %vm165_vm2, %v200_v42, 0.0 }
  0xce   :  { %v205_v38 = vadd.f32 %v204_v37, %v203_v34 }
  0xd0   :  { %v207_v41 = vadd.f32 %v206_v40, %v205_v38 }
  0xd2   :  { %v209_v44 = vadd.f32 %v208_v43, %v207_v41  ;;  %v432_v43 = vld [vmem:[#allocation2 + $0x38] sm:$0xff] }
  0xd4   :  { %v211_v46 = vadd.f32 %v210_v45, %v209_v44 }
  0xd6   :  { %v213_v48 = vadd.f32 %v212_v47, %v211_v46 }
  0xd8   :  { %v214_v49 = vrot.slane %v213_v48, 4 }
  0xda   :  { %v215_v50 = vadd.f32 %v214_v49, %v213_v48  ;;  %v431_v48 = vld [vmem:[#allocation2 + $0x30] sm:$0xff] }
  0xdc   :  { %v216_v51 = vrot.slane %v215_v50, 2 }
  0xde   :  { %v217_v52 = vadd.f32 %v216_v51, %v215_v50  ;;  %v430_v51 = vld [vmem:[#allocation2 + $0x28] sm:$0xff] }
  0xe0   :  { %v218_v53 = vrot.slane %v217_v52, 1 }
  0xe2   :  { %v219_v54 = vadd.f32 %v218_v53, %v217_v52 }
  0xe4   :  { %v220_v55 = vmul.f32 0.017857144, %v219_v54 }
  0xe6   :  { %v221_v56 = vadd.f32 1e-05, %v220_v55  ;;  %v429_v55 = vld [vmem:[#allocation2 + $0x20] sm:$0xff] }
  0xe8   :  { %3119 = vrsqrt.f32 %v221_v56 }
  0xf5   :  { %v3120_v57 = vpop.eup %3119 }
  0xf6   :  { %v225_v59 = vmul.f32 %v3120_v57, %v189_v24  ;;  %v227_v60 = vmul.f32 %v3120_v57, %v191_v26  ;;  %v228_v61 = vmul.f32 %v3120_v57, %v192_v30  ;;  %v229_v62 = vmul.f32 %v3120_v57, %v193_v35 }
  0xf7   :  { %v223_v0 = vmul.f32 %v3120_v57, %v187_v22  ;;  %v226_v1 = vmul.f32 %v3120_v57, %v190_v25  ;;  %v224_v44 = vmul.f32 %v3120_v57, %v3256_v23 }
  0xf8   :  { %v240_v2 = vmul.f32 %v3270_v58, %v229_v62  ;;  %v236_v3 = vmul.f32 %v3270_v58, %v225_v59  ;;  %v238_v6 = vmul.f32 %v3270_v58, %v227_v60  ;;  %v239_v47 = vmul.f32 %v3270_v58, %v228_v61 }
  0xf9   :  { %v234_v4 = vmul.f32 %v3270_v58, %v223_v0  ;;  %v237_v5 = vmul.f32 %v3270_v58, %v226_v1  ;;  %v235_v23 = vmul.f32 %v3270_v58, %v224_v44 }
  0xfa   :  { %v3283_v7 = vadd.f32 %v3275_v63, %v240_v2  ;;  %v3286_v8 = vadd.f32 %v3275_v63, %v236_v3  ;;  %v249_v14 = vadd.f32 %v3275_v63, %v238_v6  ;;  %v250_v57 = vadd.f32 %v3275_v63, %v239_v47  ;;  %v601_v2 = vld [vmem:[#allocation2 + $0x58] sm:$0xff]  ;;  %v600_v6 = vld [vmem:[#allocation2 + $0x50] sm:$0xff] }
  0xfb   :  { %v245_v9 = vadd.f32 %v3275_v63, %v234_v4  ;;  %v248_v10 = vadd.f32 %v3275_v63, %v237_v5  ;;  %v246_v61 = vadd.f32 %v3275_v63, %v235_v23 }
  0xfc   :  { %v3299_v26 = vmax.f32 %v249_v14, 0.0  ;;  %v3324_v3 = vmax.f32 %v250_v57, 0.0  ;;  %v254_v4 = vmax.f32 %v3286_v8, 0.0  ;;  %v3334_v14 = vmax.f32 %v3283_v7, 0.0  ;;  %v599_v8 = vld [vmem:[#allocation2 + $0x48] sm:$0xff] }
  0xfd   :  { %v252_v12 = vmax.f32 %v245_v9, 0.0  ;;  %v3290_v13 = vmax.f32 %v248_v10, 0.0  ;;  %v3331_v10 = vmax.f32 %v246_v61, 0.0 }
  0xfe   :  { %v683_v34 = vsel %vm264_vm3, %v3299_v26, -inf  ;;  %v850_v54 = vsel %vm433_vm5, %v3299_v26, -inf  ;;  %v1017_v7 = vsel %vm346_vm4, %v3299_v26, -inf  ;;  %v1184_v44 = vsel %vm515_vm6, %v3299_v26, -inf }
  0xff   :  { %v265_v15 = vsel %vm264_vm3, %v252_v12, -inf  ;;  %v347_v16 = vsel %vm346_vm4, %v3290_v13, -inf  ;;  %v434_v17 = vsel %vm433_vm5, %v252_v12, -inf  ;;  %v516_v18 = vsel %vm515_vm6, %v3290_v13, -inf }
 0x100   :  { %v266_v19 = vrot.slane %v265_v15, 4  ;;  %v348_v20 = vrot.slane %v347_v16, 4  ;;  %v435_v21 = vrot.slane %v434_v17, 4  ;;  %v517_v22 = vrot.slane %v516_v18, 4 }
 0x101   :  { %v602_v33 = vsel %vm346_vm4, %v252_v12, -inf  ;;  %v684_v40 = vrot.slane %v683_v34, 4  ;;  %v769_v56 = vsel %vm515_vm6, %v252_v12, -inf  ;;  %v851_v60 = vrot.slane %v850_v54, 4 }
 0x102   :  { %v267_v24 = vmax.f32 %v265_v15, %v266_v19  ;;  %v349_v25 = vmax.f32 %v347_v16, %v348_v20  ;;  %v436_v27 = vmax.f32 %v434_v17, %v435_v21  ;;  %v518_v28 = vmax.f32 %v516_v18, %v517_v22  ;;  %v598_v19 = vld [vmem:[#allocation2 + $0x40] sm:$0xff] }
 0x103   :  { %v603_v39 = vrot.slane %v602_v33, 4  ;;  %v685_v50 = vmax.f32 %v683_v34, %v684_v40  ;;  %v770_v1 = vrot.slane %v769_v56, 4  ;;  %v852_v9 = vmax.f32 %v850_v54, %v851_v60  ;;  %v933_v60 = vld [vmem:[#allocation2 + $0x88] sm:$0xff] }
 0x104   :  { %v268_v29 = vrot.slane %v267_v24, 2  ;;  %v350_v30 = vrot.slane %v349_v25, 2  ;;  %v437_v35 = vrot.slane %v436_v27, 2  ;;  %v519_v36 = vrot.slane %v518_v28, 2 }
 0x105   :  { %v604_v49 = vmax.f32 %v602_v33, %v603_v39  ;;  %v686_v58 = vrot.slane %v685_v50, 2  ;;  %v771_v12 = vmax.f32 %v769_v56, %v770_v1  ;;  %v3339_v15 = vsel %vm264_vm3, %v254_v4, -inf  ;;  %v768_v33 = vld [vmem:[#allocation2 + $0x78] sm:$0xff] }
 0x106   :  { %v269_v31 = vmax.f32 %v267_v24, %v268_v29  ;;  %v351_v32 = vmax.f32 %v349_v25, %v350_v30  ;;  %v438_v45 = vmax.f32 %v436_v27, %v437_v35  ;;  %v520_v46 = vmax.f32 %v518_v28, %v519_v36 }
 0x107   :  { %v605_v59 = vrot.slane %v604_v49, 2  ;;  %v687_v5 = vmax.f32 %v685_v50, %v686_v58  ;;  %v3343_v16 = vsel %vm346_vm4, %v3324_v3, -inf  ;;  %v853_v20 = vrot.slane %v852_v9, 2 }
 0x108   :  { %v270_v37 = vrot.slane %v269_v31, 1  ;;  %v352_v38 = vrot.slane %v351_v32, 1  ;;  %v439_v52 = vrot.slane %v438_v45, 1  ;;  %v521_v53 = vrot.slane %v520_v46, 1 }
 0x109   :  { %v606_v63 = vmax.f32 %v604_v49, %v605_v59  ;;  %v688_v18 = vrot.slane %v687_v5, 1  ;;  %v936_v21 = vsel %vm264_vm3, %v3331_v10, -inf  ;;  %v3352_v22 = vsel %vm433_vm5, %v254_v4, -inf }
 0x10a   :  { %v271_v41 = vmax.f32 %v269_v31, %v270_v37  ;;  %v353_v42 = vmax.f32 %v351_v32, %v352_v38  ;;  %v440_v62 = vmax.f32 %v438_v45, %v439_v52  ;;  %v522_v0 = vmax.f32 %v520_v46, %v521_v53  ;;  %v767_v38 = vld [vmem:[#allocation2 + $0x70] sm:$0xff]  ;;  %v765_v45 = vld [vmem:[#allocation2 + $0x60] sm:$0xff] }
 0x10b   :  { %v607_v17 = vrot.slane %v606_v63, 1  ;;  %v3356_v24 = vsel %vm515_vm6, %v3324_v3, -inf  ;;  %v772_v25 = vrot.slane %v771_v12, 2  ;;  %v3361_v27 = vsel %vm346_vm4, %v254_v4, -inf }
 0x10c   :  { %2806 = vmatmul.mubr.msk.f32.vlgmr.msra.gmra.mxu0 %vm165_vm2, %v271_v41  ;;  %2817 = vmatmul.mubr.msk.f32.vlgmr.msra.gmra.mxu1 %vm165_vm2, %v353_v42  ;;  %v3365_v28 = vsel %vm264_vm3, %v3334_v14, -inf  ;;  %v689_v30 = vmax.f32 %v687_v5, %v688_v18  ;;  %v937_v31 = vrot.slane %v936_v21, 4  ;;  %v1018_v32 = vrot.slane %v1017_v7, 4  ;;  %v766_v41 = vld [vmem:[#allocation2 + $0x68] sm:$0xff]  ;;  %v1101_v18 = vld [vmem:[#allocation2 + $0xb0] sm:$0xff] }
 0x10d   :  { %2820 = vmatpush3.msra.mxu0 %v432_v43  ;;  %2831 = vmatpush3.msra.mxu1 %v432_v43  ;;  %v608_v29 = vmax.f32 %v606_v63, %v607_v17  ;;  %v854_v34 = vmax.f32 %v852_v9, %v853_v20  ;;  %v3372_v35 = vsel %vm515_vm6, %v254_v4, -inf  ;;  %v3376_v36 = vsel %vm433_vm5, %v3334_v14, -inf  ;;  %v1100_v20 = vld [vmem:[#allocation2 + $0xa8] sm:$0xff] }
 0x10e   :  { %2821 = vmatprep.subr.mxu0 %v3170_v11  ;;  %2832 = vmatprep.subr.mxu1 %v3170_v11  ;;  %v773_v37 = vmax.f32 %v771_v12, %v772_v25  ;;  %v938_v39 = vmax.f32 %v936_v21, %v937_v31  ;;  %v1019_v40 = vmax.f32 %v1017_v7, %v1018_v32  ;;  %v1103_v46 = vsel %vm433_vm5, %v3331_v10, -inf }
 0x10f   :  { %2822 = vmatpush3.msra.mxu0 %v431_v48  ;;  %2833 = vmatpush3.msra.mxu1 %v431_v48  ;;  %v855_v42 = vrot.slane %v854_v34, 1  ;;  %v3392_v49 = vsel %vm264_vm3, %v3290_v13, -inf  ;;  %v3396_v50 = vsel %vm346_vm4, %v3334_v14, -inf  ;;  %v1104_v52 = vrot.slane %v1103_v46, 4 }
 0x110   :  { %2823 = vmatprep.subr.mxu0 %v3170_v11  ;;  %2834 = vmatprep.subr.mxu1 %v3170_v11  ;;  %v774_v43 = vrot.slane %v773_v37, 1  ;;  %v939_v47 = vrot.slane %v938_v39, 2  ;;  %v1020_v48 = vrot.slane %v1019_v40, 2  ;;  %v3404_v53 = vsel %vm433_vm5, %v3290_v13, -inf  ;;  %v934_v13 = vld [vmem:[#allocation2 + $0x90] sm:$0xff] }
 0x111   :  { %2824 = vmatpush3.msra.mxu0 %v430_v51  ;;  %2835 = vmatpush3.msra.mxu1 %v430_v51  ;;  %v856_v26 = vmax.f32 %v854_v34, %v855_v42  ;;  %v1185_v51 = vrot.slane %v1184_v44, 4  ;;  %v3408_v54 = vsel %vm515_vm6, %v3334_v14, -inf  ;;  %v1105_v59 = vmax.f32 %v1103_v46, %v1104_v52  ;;  %v1102_v14 = vld [vmem:[#allocation2 + $0xb8] sm:$0xff] }
 0x112   :  { %2825 = vmatprep.subr.mxu0 %v3170_v11  ;;  %2836 = vmatprep.subr.mxu1 %v3170_v11  ;;  %v775_v23 = vmax.f32 %v773_v37, %v774_v43  ;;  %v940_v56 = vmax.f32 %v938_v39, %v939_v47  ;;  %v1021_v57 = vmax.f32 %v1019_v40, %v1020_v48  ;;  %v1270_v1 = vsel %vm346_vm4, %v3331_v10, -inf  ;;  %v1266_v47 = vld [vmem:[#allocation2 + $0xc0] sm:$0xff] }
 0x113   :  { %2826 = vmatpush3.msra.mxu0 %v429_v55  ;;  %2827 = vmatprep.mubr.msk.f32.mxu0 %vm3171_vm0, %v3170_v11  ;;  %v1186_v58 = vmax.f32 %v1184_v44, %v1185_v51  ;;  %v1106_v4 = vrot.slane %v1105_v59, 2  ;;  %v1271_v9 = vrot.slane %v1270_v1, 4  ;;  %v1518_v31 = vsel %vm433_vm5, %v3324_v3, -inf  ;;  %v1267_v44 = vld [vmem:[#allocation2 + $0xc8] sm:$0xff] }
 0x114   :  { %2837 = vmatpush3.msra.mxu1 %v429_v55  ;;  %2838 = vmatprep.mubr.msk.f32.mxu1 %vm3171_vm0, %v3170_v11  ;;  %v935_v55 = vld [vmem:[#allocation2 + $0x98] sm:$0xff]  ;;  %v941_v61 = vrot.slane %v940_v56, 1  ;;  %v1519_v39 = vrot.slane %v1518_v31, 4  ;;  %v1605_v52 = vrot.slane %v3339_v15, 4 }
 0x115   :  { %2828 = vmatmul.mubr.msk.f32.vlgmr.msra.gmra.mxu0 %vm165_vm2, %v440_v62  ;;  %2839 = vmatmul.mubr.msk.f32.vlgmr.msra.gmra.mxu1 %vm165_vm2, %v522_v0  ;;  %v1022_v62 = vrot.slane %v1021_v57, 1  ;;  %v932_v0 = vld [vmem:[#allocation2 + $0x80] sm:$0xff]  ;;  %v1187_v63 = vrot.slane %v1186_v58, 2  ;;  %v1272_v7 = vmax.f32 %v1270_v1, %v1271_v9 }
 0x116   :  { %2841 = vmatprep.subr.mxu0 %v3170_v11  ;;  %2852 = vmatprep.subr.mxu1 %v3170_v11  ;;  %v942_v5 = vmax.f32 %v940_v56, %v941_v61  ;;  %v1520_v43 = vmax.f32 %v1518_v31, %v1519_v39  ;;  %v1436_v56 = vld [vmem:[#allocation2 + $0xf8] sm:$0xff]  ;;  %v1434_v61 = vld [vmem:[#allocation2 + $0xe8] sm:$0xff]  ;;  %v1433_v1 = vld [vmem:[#allocation2 + $0xe0] sm:$0xff] }
 0x117   :  { %2842 = vmatpush3.msra.mxu0 %v601_v2  ;;  %2853 = vmatpush3.msra.mxu1 %v601_v2  ;;  %v1351_v2 = vsel %vm264_vm3, %v3324_v3, -inf  ;;  %v1188_v17 = vmax.f32 %v1186_v58, %v1187_v63  ;;  %v1273_v32 = vrot.slane %v1272_v7, 2  ;;  %v1269_v3 = vld [vmem:[#allocation2 + $0xd8] sm:$0xff]  ;;  %v1606_v58 = vmax.f32 %v3339_v15, %v1605_v52  ;;  %v1768_v39 = vld [vmem:[#allocation2 + $0x128] sm:$0xff] }
 0x118   :  { %2843 = vmatprep.subr.mxu0 %v3170_v11  ;;  %2854 = vmatprep.subr.mxu1 %v3170_v11  ;;  %v1352_v12 = vrot.slane %v1351_v2, 4  ;;  %v1772_v63 = vrot.slane %v3352_v22, 4  ;;  %v1770_v31 = vld [vmem:[#allocation2 + $0x138] sm:$0xff] }
 0x119   :  { %2844 = vmatpush3.msra.mxu0 %v600_v6  ;;  %2855 = vmatpush3.msra.mxu1 %v600_v6  ;;  %v1023_v6 = vmax.f32 %v1021_v57, %v1022_v62  ;;  %v1189_v25 = vrot.slane %v1188_v17, 1 }
 0x11a   :  { %2845 = vmatprep.subr.mxu0 %v3170_v11  ;;  %2856 = vmatprep.subr.mxu1 %v3170_v11 }
 0x11b   :  { %2846 = vmatpush3.msra.mxu0 %v599_v8  ;;  %2857 = vmatpush3.msra.mxu1 %v599_v8  ;;  %v1107_v8 = vmax.f32 %v1105_v59, %v1106_v4  ;;  %v1190_v37 = vmax.f32 %v1188_v17, %v1189_v25  ;;  %v1435_v59 = vld [vmem:[#allocation2 + $0xf0] sm:$0xff] }
 0x11c   :  { %2847 = vmatprep.subr.mxu0 %v3170_v11  ;;  %2858 = vmatprep.subr.mxu1 %v3170_v11 }
 0x11d   :  { %2848 = vmatpush3.msra.mxu0 %v598_v19  ;;  %2849 = vmatprep.mubr.msk.f32.mxu0 %vm3171_vm0, %v3170_v11  ;;  %v1108_v21 = vrot.slane %v1107_v8, 1 }
 0x11e   :  { %2859 = vmatpush3.msra.mxu1 %v598_v19  ;;  %2860 = vmatprep.mubr.msk.f32.mxu1 %vm3171_vm0, %v3170_v11  ;;  %v1353_v19 = vmax.f32 %v1351_v2, %v1352_v12  ;;  %v1607_v2 = vrot.slane %v1606_v58, 2 }
 0x11f   :  { %2850 = vmatmul.mubr.msk.f32.vlgmr.msra.gmra.mxu0 %vm165_vm2, %v608_v29  ;;  %2861 = vmatmul.mubr.msk.f32.vlgmr.msra.gmra.mxu1 %vm165_vm2, %v689_v30  ;;  %v1099_v29 = vld [vmem:[#allocation2 + $0xa0] sm:$0xff]  ;;  %v1437_v30 = vsel %vm515_vm6, %v3331_v10, -inf  ;;  %v1109_v34 = vmax.f32 %v1107_v8, %v1108_v21  ;;  %v1274_v10 = vmax.f32 %v1272_v7, %v1273_v32  ;;  %v1773_v8 = vmax.f32 %v3352_v22, %v1772_v63 }
 0x120   :  { %2863 = vmatprep.subr.mxu0 %v3170_v11  ;;  %2874 = vmatprep.subr.mxu1 %v3170_v11  ;;  %v1608_v9 = vmax.f32 %v1606_v58, %v1607_v2  ;;  %v2354_v58 = vrot.slane %v3396_v50, 4  ;;  %v2101_v63 = vld [vmem:[#allocation2 + $0x160] sm:$0xff] }
 0x121   :  { %2864 = vmatpush3.msra.mxu0 %v768_v33  ;;  %2875 = vmatpush3.msra.mxu1 %v768_v33  ;;  %v1354_v33 = vrot.slane %v1353_v19, 2  ;;  %v1774_v21 = vrot.slane %v1773_v8, 2 }
 0x122   :  { %2865 = vmatprep.subr.mxu0 %v3170_v11  ;;  %2876 = vmatprep.subr.mxu1 %v3170_v11  ;;  %v1609_v7 = vrot.slane %v1608_v9, 1  ;;  %v2355_v2 = vmax.f32 %v3396_v50, %v2354_v58 }
 0x123   :  { %2866 = vmatpush3.msra.mxu0 %v767_v38  ;;  %2877 = vmatpush3.msra.mxu1 %v767_v38  ;;  %v1438_v38 = vrot.slane %v1437_v30, 4  ;;  %v1355_v40 = vmax.f32 %v1353_v19, %v1354_v33  ;;  %v1775_v32 = vmax.f32 %v1773_v8, %v1774_v21 }
 0x124   :  { %2867 = vmatprep.subr.mxu0 %v3170_v11  ;;  %2878 = vmatprep.subr.mxu1 %v3170_v11 }
 0x125   :  { %2868 = vmatpush3.msra.mxu0 %v766_v41  ;;  %2879 = vmatpush3.msra.mxu1 %v766_v41  ;;  %v1268_v41 = vld [vmem:[#allocation2 + $0xd0] sm:$0xff]  ;;  %v1439_v42 = vmax.f32 %v1437_v30, %v1438_v38  ;;  %v1356_v46 = vrot.slane %v1355_v40, 1  ;;  %v2020_v30 = vrot.slane %v3365_v28, 4 }
 0x126   :  { %2869 = vmatprep.subr.mxu0 %v3170_v11  ;;  %2880 = vmatprep.subr.mxu1 %v3170_v11 }
 0x127   :  { %2870 = vmatpush3.msra.mxu0 %v765_v45  ;;  %2871 = vmatprep.mubr.msk.f32.mxu0 %vm3171_vm0, %v3170_v11  ;;  %v1440_v48 = vrot.slane %v1439_v42, 2  ;;  %v2021_v38 = vmax.f32 %v3365_v28, %v2020_v30  ;;  %v2438_v30 = vld [vmem:[#allocation2 + $0x1b8] sm:$0xff] }
 0x128   :  { %2881 = vmatpush3.msra.mxu1 %v765_v45  ;;  %2882 = vmatprep.mubr.msk.f32.mxu1 %vm3171_vm0, %v3170_v11  ;;  %v1275_v45 = vrot.slane %v1274_v10, 1 }
 0x129   :  { %2872 = vmatmul.mubr.msk.f32.vlgmr.msra.gmra.mxu0 %vm165_vm2, %v775_v23  ;;  %2883 = vmatmul.mubr.msk.f32.vlgmr.msra.gmra.mxu1 %vm165_vm2, %v856_v26  ;;  %v1521_v26 = vrot.slane %v1520_v43, 2  ;;  %v1357_v23 = vmax.f32 %v1355_v40, %v1356_v46  ;;  %v1441_v57 = vmax.f32 %v1439_v42, %v1440_v48  ;;  %v1767_v40 = vld [vmem:[#allocation2 + $0x120] sm:$0xff]  ;;  %v1936_v48 = vld [vmem:[#allocation2 + $0x150] sm:$0xff] }
 0x12a   :  { %2885 = vmatprep.subr.mxu0 %v3170_v11  ;;  %2896 = vmatprep.subr.mxu1 %v3170_v11  ;;  %v1276_v51 = vmax.f32 %v1274_v10, %v1275_v45  ;;  %v1937_v45 = vld [vmem:[#allocation2 + $0x158] sm:$0xff] }
 0x12b   :  { %2886 = vmatpush3.msra.mxu0 %v935_v55  ;;  %2897 = vmatpush3.msra.mxu1 %v935_v55  ;;  %v1686_v55 = vrot.slane %v3343_v16, 4  ;;  %v1442_v62 = vrot.slane %v1441_v57, 1 }
 0x12c   :  { %2887 = vmatprep.subr.mxu0 %v3170_v11  ;;  %2898 = vmatprep.subr.mxu1 %v3170_v11 }
 0x12d   :  { %2888 = vmatpush3.msra.mxu0 %v934_v13  ;;  %2899 = vmatpush3.msra.mxu1 %v934_v13  ;;  %v1522_v13 = vmax.f32 %v1520_v43, %v1521_v26  ;;  %v2106_v43 = vrot.slane %v3372_v35, 4 }
 0x12e   :  { %2889 = vmatprep.subr.mxu0 %v3170_v11  ;;  %2900 = vmatprep.subr.mxu1 %v3170_v11 }
 0x12f   :  { %2890 = vmatpush3.msra.mxu0 %v933_v60  ;;  %2901 = vmatpush3.msra.mxu1 %v933_v60  ;;  %v1687_v60 = vmax.f32 %v3343_v16, %v1686_v55  ;;  %v1443_v16 = vmax.f32 %v1441_v57, %v1442_v62  ;;  %v2107_v26 = vmax.f32 %v3372_v35, %v2106_v43 }
 0x130   :  { %2891 = vmatprep.subr.mxu0 %v3170_v11  ;;  %2902 = vmatprep.subr.mxu1 %v3170_v11 }
 0x131   :  { %2892 = vmatpush3.msra.mxu0 %v932_v0  ;;  %2893 = vmatprep.mubr.msk.f32.mxu0 %vm3171_vm0, %v3170_v11  ;;  %v1688_v15 = vrot.slane %v1687_v60, 2  ;;  %v2108_v57 = vrot.slane %v2107_v26, 2 }
 0x132   :  { %2903 = vmatpush3.msra.mxu1 %v932_v0  ;;  %2904 = vmatprep.mubr.msk.f32.mxu1 %vm3171_vm0, %v3170_v11  ;;  %v1523_v0 = vrot.slane %v1522_v13, 1 }
 0x133   :  { %2894 = vmatmul.mubr.msk.f32.vlgmr.msra.gmra.mxu0 %vm165_vm2, %v942_v5  ;;  %2905 = vmatmul.mubr.msk.f32.vlgmr.msra.gmra.mxu1 %vm165_vm2, %v1023_v6  ;;  %v1853_v5 = vrot.slane %v3356_v24, 4  ;;  %v1603_v6 = vld [vmem:[#allocation2 + $0x118] sm:$0xff]  ;;  %v1689_v12 = vmax.f32 %v1687_v60, %v1688_v15  ;;  %v2102_v15 = vld [vmem:[#allocation2 + $0x168] sm:$0xff] }
 0x134   :  { %2907 = vmatprep.subr.mxu0 %v3170_v11  ;;  %2918 = vmatprep.subr.mxu1 %v3170_v11  ;;  %v1524_v4 = vmax.f32 %v1522_v13, %v1523_v0  ;;  %v2104_v60 = vld [vmem:[#allocation2 + $0x178] sm:$0xff]  ;;  %v2103_v0 = vld [vmem:[#allocation2 + $0x170] sm:$0xff] }
 0x135   :  { %2908 = vmatpush3.msra.mxu0 %v1102_v14  ;;  %2919 = vmatpush3.msra.mxu1 %v1102_v14  ;;  %v1602_v14 = vld [vmem:[#allocation2 + $0x110] sm:$0xff]  ;;  %v1854_v17 = vmax.f32 %v3356_v24, %v1853_v5  ;;  %v1690_v19 = vrot.slane %v1689_v12, 1  ;;  %v1610_v24 = vmax.f32 %v1608_v9, %v1609_v7  ;;  %v2440_v9 = vrot.slane %v3404_v53, 4 }
 0x136   :  { %2909 = vmatprep.subr.mxu0 %v3170_v11  ;;  %2920 = vmatprep.subr.mxu1 %v3170_v11 }
 0x137   :  { %2910 = vmatpush3.msra.mxu0 %v1101_v18  ;;  %2921 = vmatpush3.msra.mxu1 %v1101_v18  ;;  %v1601_v18 = vld [vmem:[#allocation2 + $0x108] sm:$0xff]  ;;  %v1855_v22 = vrot.slane %v1854_v17, 2  ;;  %v1691_v25 = vmax.f32 %v1689_v12, %v1690_v19  ;;  %v2521_v12 = vrot.slane %v3408_v54, 4  ;;  %v2441_v7 = vmax.f32 %v3404_v53, %v2440_v9 }
 0x138   :  { %2911 = vmatprep.subr.mxu0 %v3170_v11  ;;  %2922 = vmatprep.subr.mxu1 %v3170_v11 }
 0x139   :  { %2912 = vmatpush3.msra.mxu0 %v1100_v20  ;;  %2923 = vmatpush3.msra.mxu1 %v1100_v20  ;;  %v1600_v20 = vld [vmem:[#allocation2 + $0x100] sm:$0xff]  ;;  %v1856_v33 = vmax.f32 %v1854_v17, %v1855_v22  ;;  %v2522_v19 = vmax.f32 %v3408_v54, %v2521_v12 }
 0x13a   :  { %2913 = vmatprep.subr.mxu0 %v3170_v11  ;;  %2924 = vmatprep.subr.mxu1 %v3170_v11 }
 0x13b   :  { %2914 = vmatpush3.msra.mxu0 %v1099_v29  ;;  %2915 = vmatprep.mubr.msk.f32.mxu0 %vm3171_vm0, %v3170_v11  ;;  %v1857_v10 = vrot.slane %v1856_v33, 1  ;;  %v2523_v53 = vrot.slane %v2522_v19, 2 }
 0x13c   :  { %2925 = vmatpush3.msra.mxu1 %v1099_v29  ;;  %2926 = vmatprep.mubr.msk.f32.mxu1 %vm3171_vm0, %v3170_v11  ;;  %v1939_v29 = vrot.slane %v3361_v27, 4 }
 0x13d   :  { %2916 = vmatmul.mubr.msk.f32.vlgmr.msra.gmra.mxu0 %vm165_vm2, %v1109_v34  ;;  %2927 = vmatmul.mubr.msk.f32.vlgmr.msra.gmra.mxu1 %vm165_vm2, %v1190_v37  ;;  %v1769_v34 = vld [vmem:[#allocation2 + $0x130] sm:$0xff]  ;;  %v1858_v42 = vmax.f32 %v1856_v33, %v1857_v10 }
 0x13e   :  { %2929 = vmatprep.subr.mxu0 %v3170_v11  ;;  %2940 = vmatprep.subr.mxu1 %v3170_v11  ;;  %v1940_v37 = vmax.f32 %v3361_v27, %v1939_v29  ;;  %v2022_v27 = vrot.slane %v2021_v38, 2  ;;  %v2437_v33 = vld [vmem:[#allocation2 + $0x1b0] sm:$0xff] }
 0x13f   :  { %2930 = vmatpush3.msra.mxu0 %v1269_v3  ;;  %2941 = vmatpush3.msra.mxu1 %v1269_v3  ;;  %v1776_v3 = vrot.slane %v1775_v32, 1 }
 0x140   :  { %2931 = vmatprep.subr.mxu0 %v3170_v11  ;;  %2942 = vmatprep.subr.mxu1 %v3170_v11 }
 0x141   :  { %2932 = vmatpush3.msra.mxu0 %v1268_v41  ;;  %2943 = vmatpush3.msra.mxu1 %v1268_v41  ;;  %v1941_v41 = vrot.slane %v1940_v37, 2  ;;  %v1777_v28 = vmax.f32 %v1775_v32, %v1776_v3  ;;  %v2524_v32 = vmax.f32 %v2522_v19, %v2523_v53 }
 0x142   :  { %2933 = vmatprep.subr.mxu0 %v3170_v11  ;;  %2944 = vmatprep.subr.mxu1 %v3170_v11 }
 0x143   :  { %2934 = vmatpush3.msra.mxu0 %v1267_v44  ;;  %2945 = vmatpush3.msra.mxu1 %v1267_v44  ;;  %v2187_v44 = vrot.slane %v3376_v36, 4  ;;  %v1942_v46 = vmax.f32 %v1940_v37, %v1941_v41 }
 0x144   :  { %2935 = vmatprep.subr.mxu0 %v3170_v11  ;;  %2946 = vmatprep.subr.mxu1 %v3170_v11 }
 0x145   :  { %2936 = vmatpush3.msra.mxu0 %v1266_v47  ;;  %2937 = vmatprep.mubr.msk.f32.mxu0 %vm3171_vm0, %v3170_v11  ;;  %v1943_v52 = vrot.slane %v1942_v46, 1 }
 0x146   :  { %2947 = vmatpush3.msra.mxu1 %v1266_v47  ;;  %2948 = vmatprep.mubr.msk.f32.mxu1 %vm3171_vm0, %v3170_v11  ;;  %v2023_v47 = vmax.f32 %v2021_v38, %v2022_v27  ;;  %v2525_v38 = vrot.slane %v2524_v32, 1 }
 0x147   :  { %2938 = vmatmul.mubr.msk.f32.vlgmr.msra.gmra.mxu0 %vm165_vm2, %v1276_v51  ;;  %2949 = vmatmul.mubr.msk.f32.vlgmr.msra.gmra.mxu1 %vm165_vm2, %v1357_v23  ;;  %v2188_v51 = vmax.f32 %v3376_v36, %v2187_v44  ;;  %v1935_v23 = vld [vmem:[#allocation2 + $0x148] sm:$0xff]  ;;  %v1944_v36 = vmax.f32 %v1942_v46, %v1943_v52 }
 0x148   :  { %2951 = vmatprep.subr.mxu0 %v3170_v11  ;;  %2962 = vmatprep.subr.mxu1 %v3170_v11  ;;  %v2024_v55 = vrot.slane %v2023_v47, 1  ;;  %v2526_v10 = vmax.f32 %v2524_v32, %v2525_v38 }
 0x149   :  { %2952 = vmatpush3.msra.mxu0 %v1436_v56  ;;  %2963 = vmatpush3.msra.mxu1 %v1436_v56  ;;  %v1934_v56 = vld [vmem:[#allocation2 + $0x140] sm:$0xff]  ;;  %v2189_v35 = vrot.slane %v2188_v51, 2 }
 0x14a   :  { %2953 = vmatprep.subr.mxu0 %v3170_v11  ;;  %2964 = vmatprep.subr.mxu1 %v3170_v11  ;;  %v2025_v13 = vmax.f32 %v2023_v47, %v2024_v55 }
 0x14b   :  { %2954 = vmatpush3.msra.mxu0 %v1435_v59  ;;  %2965 = vmatpush3.msra.mxu1 %v1435_v59  ;;  %v2273_v59 = vrot.slane %v3392_v49, 4  ;;  %v2190_v62 = vmax.f32 %v2188_v51, %v2189_v35 }
 0x14c   :  { %2955 = vmatprep.subr.mxu0 %v3170_v11  ;;  %2966 = vmatprep.subr.mxu1 %v3170_v11 }
 0x14d   :  { %2956 = vmatpush3.msra.mxu0 %v1434_v61  ;;  %2967 = vmatpush3.msra.mxu1 %v1434_v61  ;;  %v2109_v61 = vmax.f32 %v2107_v26, %v2108_v57 }
 0x14e   :  { %2957 = vmatprep.subr.mxu0 %v3170_v11  ;;  %2968 = vmatprep.subr.mxu1 %v3170_v11 }
 0x14f   :  { %2958 = vmatpush3.msra.mxu0 %v1433_v1  ;;  %2959 = vmatprep.mubr.msk.f32.mxu0 %vm3171_vm0, %v3170_v11 }
 0x150   :  { %2969 = vmatpush3.msra.mxu1 %v1433_v1  ;;  %2970 = vmatprep.mubr.msk.f32.mxu1 %vm3171_vm0, %v3170_v11  ;;  %v2274_v1 = vmax.f32 %v3392_v49, %v2273_v59  ;;  %v2356_v49 = vrot.slane %v2355_v2, 2 }
 0x151   :  { %2960 = vmatmul.mubr.msk.f32.vlgmr.msra.gmra.mxu0 %vm165_vm2, %v1443_v16  ;;  %2971 = vmatmul.mubr.msk.f32.vlgmr.msra.gmra.mxu1 %vm165_vm2, %v1524_v4  ;;  %v2110_v16 = vrot.slane %v2109_v61, 1  ;;  %v2191_v4 = vrot.slane %v2190_v62, 1 }
 0x152   :  { %2973 = vmatprep.subr.mxu0 %v3170_v11  ;;  %2984 = vmatprep.subr.mxu1 %v3170_v11  ;;  %v2275_v5 = vrot.slane %v2274_v1, 2  ;;  %v2357_v17 = vmax.f32 %v2355_v2, %v2356_v49 }
 0x153   :  { %2974 = vmatpush3.msra.mxu0 %v1603_v6  ;;  %2985 = vmatpush3.msra.mxu1 %v1603_v6  ;;  %v2111_v50 = vmax.f32 %v2109_v61, %v2110_v16  ;;  %v2192_v6 = vmax.f32 %v2190_v62, %v2191_v4 }
 0x154   :  { %2975 = vmatprep.subr.mxu0 %v3170_v11  ;;  %2986 = vmatprep.subr.mxu1 %v3170_v11  ;;  %v2276_v8 = vmax.f32 %v2274_v1, %v2275_v5  ;;  %v2358_v22 = vrot.slane %v2357_v17, 1 }
 0x155   :  { %2976 = vmatpush3.msra.mxu0 %v1602_v14  ;;  %2987 = vmatpush3.msra.mxu1 %v1602_v14  ;;  %v2271_v14 = vld [vmem:[#allocation2 + $0x198] sm:$0xff] }
 0x156   :  { %2977 = vmatprep.subr.mxu0 %v3170_v11  ;;  %2988 = vmatprep.subr.mxu1 %v3170_v11  ;;  %v2277_v21 = vrot.slane %v2276_v8, 1  ;;  %v2359_v29 = vmax.f32 %v2357_v17, %v2358_v22 }
 0x157   :  { %2978 = vmatpush3.msra.mxu0 %v1601_v18  ;;  %2989 = vmatpush3.msra.mxu1 %v1601_v18  ;;  %v2270_v18 = vld [vmem:[#allocation2 + $0x190] sm:$0xff] }
 0x158   :  { %2979 = vmatprep.subr.mxu0 %v3170_v11  ;;  %2990 = vmatprep.subr.mxu1 %v3170_v11  ;;  %v2278_v54 = vmax.f32 %v2276_v8, %v2277_v21 }
 0x159   :  { %2980 = vmatpush3.msra.mxu0 %v1600_v20  ;;  %2981 = vmatprep.mubr.msk.f32.mxu0 %vm3171_vm0, %v3170_v11 }
 0x15a   :  { %2991 = vmatpush3.msra.mxu1 %v1600_v20  ;;  %2992 = vmatprep.mubr.msk.f32.mxu1 %vm3171_vm0, %v3170_v11  ;;  %v2269_v20 = vld [vmem:[#allocation2 + $0x188] sm:$0xff] }
 0x15b   :  { %2982 = vmatmul.mubr.msk.f32.vlgmr.msra.gmra.mxu0 %vm165_vm2, %v1610_v24  ;;  %2993 = vmatmul.mubr.msk.f32.vlgmr.msra.gmra.mxu1 %vm165_vm2, %v1691_v25  ;;  %v2268_v24 = vld [vmem:[#allocation2 + $0x180] sm:$0xff]  ;;  %v2442_v25 = vrot.slane %v2441_v7, 2 }
 0x15c   :  { %2995 = vmatprep.subr.mxu0 %v3170_v11  ;;  %3006 = vmatprep.subr.mxu1 %v3170_v11 }
 0x15d   :  { %2996 = vmatpush3.msra.mxu0 %v1770_v31  ;;  %3007 = vmatpush3.msra.mxu1 %v1770_v31  ;;  %v2443_v31 = vmax.f32 %v2441_v7, %v2442_v25 }
 0x15e   :  { %2997 = vmatprep.subr.mxu0 %v3170_v11  ;;  %3008 = vmatprep.subr.mxu1 %v3170_v11 }
 0x15f   :  { %2998 = vmatpush3.msra.mxu0 %v1769_v34  ;;  %3009 = vmatpush3.msra.mxu1 %v1769_v34  ;;  %v2436_v34 = vld [vmem:[#allocation2 + $0x1a8] sm:$0xff]  ;;  %v2444_v37 = vrot.slane %v2443_v31, 1 }
 0x160   :  { %2999 = vmatprep.subr.mxu0 %v3170_v11  ;;  %3010 = vmatprep.subr.mxu1 %v3170_v11 }
 0x161   :  { %3000 = vmatpush3.msra.mxu0 %v1768_v39  ;;  %3011 = vmatpush3.msra.mxu1 %v1768_v39  ;;  %v2435_v39 = vld [vmem:[#allocation2 + $0x1a0] sm:$0xff]  ;;  %v2445_v3 = vmax.f32 %v2443_v31, %v2444_v37 }
 0x162   :  { %3001 = vmatprep.subr.mxu0 %v3170_v11  ;;  %3012 = vmatprep.subr.mxu1 %v3170_v11 }
 0x163   :  { %3002 = vmatpush3.msra.mxu0 %v1767_v40  ;;  %3003 = vmatprep.mubr.msk.f32.mxu0 %vm3171_vm0, %v3170_v11 }
 0x164   :  { %3013 = vmatpush3.msra.mxu1 %v1767_v40  ;;  %3014 = vmatprep.mubr.msk.f32.mxu1 %vm3171_vm0, %v3170_v11 }
 0x165   :  { %3004 = vmatmul.mubr.msk.f32.vlgmr.msra.gmra.mxu0 %vm165_vm2, %v1777_v28  ;;  %3015 = vmatmul.mubr.msk.f32.vlgmr.msra.gmra.mxu1 %vm165_vm2, %v1858_v42  ;;  %v259_v42 = vld [vmem:[%s3595_s3] sm:$0x1]  ;;  %s3172_s3 = smov [#allocation5]  }
 0x166   :  { %3017 = vmatprep.subr.mxu0 %v3170_v11  ;;  %3028 = vmatprep.subr.mxu1 %v3170_v11  ;;  %s2616_s19 = sshll.u32 %s3172_s3, 4  ;;  %s2617_s19 = int_to_ptr.vmem [resolvable:$true] %s2616_s19 }
 0x167   :  { %3018 = vmatpush3.msra.mxu0 %v1937_v45  ;;  %3029 = vmatpush3.msra.mxu1 %v1937_v45  ;;  %s3141_s20 = scalar_lea.vmem %s2617_s19, 32  ;;  %p3146_p6 = scmp.lt.s32.totalorder %s2617_s19, %s2617_s19 }
 0x168   :  { %3019 = vmatprep.subr.mxu0 %v3170_v11  ;;  %3030 = vmatprep.subr.mxu1 %v3170_v11  ;;  %p3142_p5 = scmp.ne.s32.totalorder %s2617_s19, %s3141_s20  ;;  %p3147_p7 = scmp.lt.s32.totalorder %s3141_s20, %s3141_s20 }
 0x169   :  { %3020 = vmatpush3.msra.mxu0 %v1936_v48  ;;  %3031 = vmatpush3.msra.mxu1 %v1936_v48 }
 0x16a   :  { %3021 = vmatprep.subr.mxu0 %v3170_v11  ;;  %3032 = vmatprep.subr.mxu1 %v3170_v11  ;;  %p3148_p8 = por %p3147_p7, %p3146_p6 }
 0x16b   :  { %3022 = vmatpush3.msra.mxu0 %v1935_v23  ;;  %3033 = vmatpush3.msra.mxu1 %v1935_v23 }
 0x16c   :  { %3023 = vmatprep.subr.mxu0 %v3170_v11  ;;  %3034 = vmatprep.subr.mxu1 %v3170_v11  ;;  %p3149_p9 = pnand %p3148_p8, %p3142_p5 }
 0x16d   :  { %3024 = vmatpush3.msra.mxu0 %v1934_v56  ;;  %3025 = vmatprep.mubr.msk.f32.mxu0 %vm3171_vm0, %v3170_v11 }
 0x16e   :  { %3035 = vmatpush3.msra.mxu1 %v1934_v56  ;;  %3036 = vmatprep.mubr.msk.f32.mxu1 %vm3171_vm0, %v3170_v11 }
 0x16f   :  { %3026 = vmatmul.mubr.msk.f32.vlgmr.msra.gmra.mxu0 %vm165_vm2, %v1944_v36  ;;  %3037 = vmatmul.mubr.msk.f32.vlgmr.msra.gmra.mxu1 %vm165_vm2, %v2025_v13 }
 0x170   :  { %3039 = vmatprep.subr.mxu0 %v3170_v11  ;;  %3050 = vmatprep.subr.mxu1 %v3170_v11 }
 0x171   :  { %3040 = vmatpush3.msra.mxu0 %v2104_v60  ;;  %3051 = vmatpush3.msra.mxu1 %v2104_v60 }
 0x172   :  { %3041 = vmatprep.subr.mxu0 %v3170_v11  ;;  %3052 = vmatprep.subr.mxu1 %v3170_v11 }
 0x173   :  { %3042 = vmatpush3.msra.mxu0 %v2103_v0  ;;  %3053 = vmatpush3.msra.mxu1 %v2103_v0 }
 0x174   :  { %3043 = vmatprep.subr.mxu0 %v3170_v11  ;;  %3054 = vmatprep.subr.mxu1 %v3170_v11 }
 0x175   :  { %3044 = vmatpush3.msra.mxu0 %v2102_v15  ;;  %3055 = vmatpush3.msra.mxu1 %v2102_v15 }
 0x176   :  { %3045 = vmatprep.subr.mxu0 %v3170_v11  ;;  %3056 = vmatprep.subr.mxu1 %v3170_v11 }
 0x177   :  { %3046 = vmatpush3.msra.mxu0 %v2101_v63  ;;  %3047 = vmatprep.mubr.msk.f32.mxu0 %vm3171_vm0, %v3170_v11 }
 0x178   :  { %3057 = vmatpush3.msra.mxu1 %v2101_v63  ;;  %3058 = vmatprep.mubr.msk.f32.mxu1 %vm3171_vm0, %v3170_v11 }
 0x179   :  { %3048 = vmatmul.mubr.msk.f32.vlgmr.msra.gmra.mxu0 %vm165_vm2, %v2111_v50  ;;  %3059 = vmatmul.mubr.msk.f32.vlgmr.msra.gmra.mxu1 %vm165_vm2, %v2192_v6 }
 0x17a   :  { %3061 = vmatprep.subr.mxu0 %v3170_v11  ;;  %3072 = vmatprep.subr.mxu1 %v3170_v11 }
 0x17b   :  { %3062 = vmatpush3.msra.mxu0 %v2271_v14  ;;  %3073 = vmatpush3.msra.mxu1 %v2271_v14 }
 0x17c   :  { %3063 = vmatprep.subr.mxu0 %v3170_v11  ;;  %3074 = vmatprep.subr.mxu1 %v3170_v11 }
 0x17d   :  { %3064 = vmatpush3.msra.mxu0 %v2270_v18  ;;  %3075 = vmatpush3.msra.mxu1 %v2270_v18 }
 0x17e   :  { %3065 = vmatprep.subr.mxu0 %v3170_v11  ;;  %3076 = vmatprep.subr.mxu1 %v3170_v11 }
 0x17f   :  { %3066 = vmatpush3.msra.mxu0 %v2269_v20  ;;  %3077 = vmatpush3.msra.mxu1 %v2269_v20 }
 0x180   :  { %3067 = vmatprep.subr.mxu0 %v3170_v11  ;;  %3078 = vmatprep.subr.mxu1 %v3170_v11 }
 0x181   :  { %3068 = vmatpush3.msra.mxu0 %v2268_v24  ;;  %3069 = vmatprep.mubr.msk.f32.mxu0 %vm3171_vm0, %v3170_v11 }
 0x182   :  { %3079 = vmatpush3.msra.mxu1 %v2268_v24  ;;  %3080 = vmatprep.mubr.msk.f32.mxu1 %vm3171_vm0, %v3170_v11 }
 0x183   :  { %3070 = vmatmul.mubr.msk.f32.vlgmr.msra.gmra.mxu0 %vm165_vm2, %v2278_v54  ;;  %3081 = vmatmul.mubr.msk.f32.vlgmr.msra.gmra.mxu1 %vm165_vm2, %v2359_v29 }
 0x184   :  { %3083 = vmatprep.subr.mxu0 %v3170_v11  ;;  %3094 = vmatprep.subr.mxu1 %v3170_v11 }
 0x185   :  { %3084 = vmatpush3.msra.mxu0 %v2438_v30  ;;  %3095 = vmatpush3.msra.mxu1 %v2438_v30 }
 0x186   :  { %3085 = vmatprep.subr.mxu0 %v3170_v11  ;;  %3096 = vmatprep.subr.mxu1 %v3170_v11 }
 0x187   :  { %3086 = vmatpush3.msra.mxu0 %v2437_v33  ;;  %3097 = vmatpush3.msra.mxu1 %v2437_v33 }
 0x188   :  { %3087 = vmatprep.subr.mxu0 %v3170_v11  ;;  %3098 = vmatprep.subr.mxu1 %v3170_v11 }
 0x189   :  { %3088 = vmatpush3.msra.mxu0 %v2436_v34  ;;  %3099 = vmatpush3.msra.mxu1 %v2436_v34 }
 0x18a   :  { %3089 = vmatprep.subr.mxu0 %v3170_v11  ;;  %3100 = vmatprep.subr.mxu1 %v3170_v11 }
 0x18b   :  { %3090 = vmatpush3.msra.mxu0 %v2435_v39  ;;  %3091 = vmatprep.mubr.msk.f32.mxu0 %vm3171_vm0, %v3170_v11 }
 0x18c   :  { %3101 = vmatpush3.msra.mxu1 %v2435_v39  ;;  %3102 = vmatprep.mubr.msk.f32.mxu1 %vm3171_vm0, %v3170_v11 }
 0x18d   :  { %3092 = vmatmul.mubr.msk.f32.vlgmr.msra.gmra.mxu0 %vm165_vm2, %v2445_v3  ;;  %3103 = vmatmul.mubr.msk.f32.vlgmr.msra.gmra.mxu1 %vm165_vm2, %v2526_v10 }
 0x1cc   :  { %v341_v40 = vpop.f32.mrf.mxu0  ;;  %v423_v41 = vpop.f32.mrf.mxu1 }
 0x1cd   :  { %v345_v43 = vadd.f32 %v341_v40, %v259_v42  ;;  %v427_v44 = vadd.f32 %v423_v41, %v259_v42  ;;  %v2602_v42 = vlaneseq }
 0x1ce   :  { %v2807_v27 = vpop.f32.mrf.mxu0  ;;  %v2818_v28 = vpop.f32.mrf.mxu1 }
 0x1d5   :  { %v510_v45 = vpop.f32.mrf.mxu0  ;;  %v592_v46 = vpop.f32.mrf.mxu1 }
 0x1d6   :  { %v514_v47 = vadd.f32 %v510_v45, %v345_v43  ;;  %v596_v48 = vadd.f32 %v592_v46, %v427_v44 }
 0x1d7   :  { %v2829_v26 = vpop.f32.mrf.mxu0  ;;  %v2840_v11 = vpop.f32.mrf.mxu1 }
 0x1d8   :  { %v2603_v26 = vshrl.u32 %v2602_v42, 7 }
 0x1df   :  { %v678_v51 = vpop.f32.mrf.mxu0  ;;  %v759_v23 = vpop.f32.mrf.mxu1 }
 0x1e0   :  { %v682_v52 = vadd.f32 %v678_v51, %v514_v47  ;;  %v763_v55 = vadd.f32 %v759_v23, %v596_v48 }
 0x1e1   :  { %v2851_v56 = vpop.f32.mrf.mxu0  ;;  %v2862_v57 = vpop.f32.mrf.mxu1 }
 0x1e9   :  { %v845_v35 = vpop.f32.mrf.mxu0  ;;  %v926_v36 = vpop.f32.mrf.mxu1 }
 0x1ea   :  { %v849_v13 = vadd.f32 %v845_v35, %v682_v52  ;;  %v930_v59 = vadd.f32 %v926_v36, %v763_v55  ;;  %v2604_v55 = vsub.s32 0, %v2603_v26 }
 0x1eb   :  { %v2873_v58 = vpop.f32.mrf.mxu0  ;;  %v2884_v60 = vpop.f32.mrf.mxu1 }
 0x1f3   :  { %v1012_v61 = vpop.f32.mrf.mxu0  ;;  %v1093_v62 = vpop.f32.mrf.mxu1 }
 0x1f4   :  { %v1016_v0 = vadd.f32 %v1012_v61, %v849_v13  ;;  %v1097_v1 = vadd.f32 %v1093_v62, %v930_v59 }
 0x1f5   :  { %v2895_v2 = vpop.f32.mrf.mxu0  ;;  %v2906_v15 = vpop.f32.mrf.mxu1 }
 0x1fd   :  { %v1179_v16 = vpop.f32.mrf.mxu0  ;;  %v1260_v4 = vpop.f32.mrf.mxu1 }
 0x1fe   :  { %v1183_v63 = vadd.f32 %v1179_v16, %v1016_v0  ;;  %v1264_v5 = vadd.f32 %v1260_v4, %v1097_v1 }
 0x1ff   :  { %v2917_v49 = vpop.f32.mrf.mxu0  ;;  %v2928_v50 = vpop.f32.mrf.mxu1 }
 0x207   :  { %v1346_v6 = vpop.f32.mrf.mxu0  ;;  %v1427_v9 = vpop.f32.mrf.mxu1 }
 0x208   :  { %v1431_v39 = vadd.f32 %v1427_v9, %v1264_v5  ;;  %v1350_v3 = vadd.f32 %v1346_v6, %v1183_v63 }
 0x209   :  { %v2939_v12 = vpop.f32.mrf.mxu0  ;;  %v2950_v14 = vpop.f32.mrf.mxu1 }
 0x211   :  { %v1513_v8 = vpop.f32.mrf.mxu0  ;;  %v1594_v17 = vpop.f32.mrf.mxu1 }
 0x212   :  { %v1598_v10 = vadd.f32 %v1594_v17, %v1431_v39  ;;  %v1517_v27 = vadd.f32 %v1513_v8, %v1350_v3 }
 0x213   :  { %v2961_v18 = vpop.f32.mrf.mxu0  ;;  %v2972_v7 = vpop.f32.mrf.mxu1 }
 0x21b   :  { %v1680_v19 = vpop.f32.mrf.mxu0  ;;  %v1761_v20 = vpop.f32.mrf.mxu1 }
 0x21c   :  { %v1765_v28 = vadd.f32 %v1761_v20, %v1598_v10  ;;  %v1684_v45 = vadd.f32 %v1680_v19, %v1517_v27 }
 0x21d   :  { %v2983_v21 = vpop.f32.mrf.mxu0  ;;  %v2994_v22 = vpop.f32.mrf.mxu1 }
 0x225   :  { %v1847_v24 = vpop.f32.mrf.mxu0  ;;  %v1928_v25 = vpop.f32.mrf.mxu1 }
 0x226   :  { %v1932_v46 = vadd.f32 %v1928_v25, %v1765_v28  ;;  %v1851_v47 = vadd.f32 %v1847_v24, %v1684_v45 }
 0x227   :  { %v3005_v53 = vpop.f32.mrf.mxu0  ;;  %v3016_v54 = vpop.f32.mrf.mxu1 }
 0x22f   :  { %v2014_v29 = vpop.f32.mrf.mxu0  ;;  %v2095_v30 = vpop.f32.mrf.mxu1 }
 0x230   :  { %v2099_v48 = vadd.f32 %v2095_v30, %v1932_v46  ;;  %v2018_v11 = vadd.f32 %v2014_v29, %v1851_v47 }
 0x231   :  { %v3027_v31 = vpop.f32.mrf.mxu0  ;;  %v3038_v32 = vpop.f32.mrf.mxu1 }
 0x239   :  { %v2181_v33 = vpop.f32.mrf.mxu0  ;;  %v2262_v34 = vpop.f32.mrf.mxu1 }
 0x23a   :  { %v2266_v51 = vadd.f32 %v2262_v34, %v2099_v48  ;;  %v2185_v23 = vadd.f32 %v2181_v33, %v2018_v11 }
 0x23b   :  { %v3049_v37 = vpop.f32.mrf.mxu0  ;;  %v3060_v38 = vpop.f32.mrf.mxu1 }
 0x243   :  { %v2348_v40 = vpop.f32.mrf.mxu0  ;;  %v2429_v41 = vpop.f32.mrf.mxu1 }
 0x244   :  { %v2433_v52 = vadd.f32 %v2429_v41, %v2266_v51  ;;  %v2352_v35 = vadd.f32 %v2348_v40, %v2185_v23 }
 0x245   :  { %v3071_v43 = vpop.f32.mrf.mxu0  ;;  %v3082_v44 = vpop.f32.mrf.mxu1 }
 0x24d   :  { %v2515_v56 = vpop.f32.mrf.mxu0  ;;  %v2596_v57 = vpop.f32.mrf.mxu1 }
 0x24e   :  { %v2600_v36 = vadd.f32 %v2596_v57, %v2433_v52  ;;  %v2519_v58 = vadd.f32 %v2515_v56, %v2352_v35 }
 0x24f   :  { %v3093_v13 = vpop.f32.mrf.mxu0  ;;  %v3104_v59 = vpop.f32.mrf.mxu1 }
 0x250   :  { %v2605_v60 = vrot.slane %v2600_v36, %v2604_v55 }
 0x252   :  { %v2608_v61 = vsel %vm2607_vm7, %v2519_v58, %v2605_v60 }
 0x253   :  { %2609 = vst [vmem:[#allocation5] sm:$0x3] %v2608_v61 }
 0x254   :  { %3152 = shalt.err (!%p3149_p9)
}
 0x255   :  { %2619 = dma.vmem_to_hbm [thread:$0]  %s2617_s19, 32, %s3596_s4, [#allocation4]  }
 0x256   :  { %3163 = dma.done.wait [#allocation4], 32  }
 0x257   :  { %3164 = vsyncadd [#allocation4], 4294967264 }
 0x258   :  { %2623 = vsyncpa [#allocation3], 1 }
 0x259   :  { %2624 = vsyncpa [#allocation4], 1 }

</bundles_post_ra>
